<compile_context>
chip_gen: v7x
topology: tpu7x:2x2x1
jax: 0.10.0
libtpu: 0.0.40
codegen_flags: <defaults>
</compile_context>

<pallas_src>
import functools

import jax
import jax.numpy as jnp
from jax.experimental import pallas as pl
from jax.experimental.pallas import tpu as pltpu


def _round_up(n, m):
    return ((n + m - 1) // m) * m


def _nnue_kernel(x_ref, w1_ref, b1_ref, w2_ref, b2_ref, o_ref):
    # fc1 on the MXU: bf16 x bf16 -> f32 accumulate.
    # [TB, 768] @ [768, 1024] + [1, 1024] -> [TB, 1024]
    h = jnp.dot(x_ref[...], w1_ref[...], preferred_element_type=jnp.float32)
    h = h + b1_ref[...]

    # fc2 with the CReLU concat folded in:
    #   relu(h).w2[:H] + relu(-h).w2[H:]  ==  sum(h * where(h > 0, w2p, -w2n))
    # VPU select/multiply + XLU lane reduction; w2 stays lane-dense [2, 1024].
    w_pos = w2_ref[0:1, :]                              # [1, 1024]
    w_neg = w2_ref[1:2, :]                              # [1, 1024]
    w_sel = jnp.where(h > 0.0, w_pos, -w_neg)           # [TB, 1024]
    logit = jnp.sum(h * w_sel, axis=-1, keepdims=True) + b2_ref[0]   # [TB, 1]

    o_ref[...] = 1.0 / (1.0 + jnp.exp(-logit))          # sigmoid


@functools.partial(jax.jit, static_argnames=("block_b",))
def chess_nnue_forward(x, w1_t, b1, w2_t, b2, *, block_b=256):
    """x: [B, 768]; w1_t: [768, 1024]; b1: [1024]; w2_t: [2048, 1]; b2: [1]."""
    B = x.shape[0]
    IN, H = w1_t.shape                                  # 768, 1024

    # bf16 operands for the bandwidth-bound fc1 matmul (fp32 accumulation).
    # TODO(synk): int8 W1 (v5e/v6e) or fp8 (v7x) would cut HBM traffic further.
    x_bf = x.astype(jnp.bfloat16)
    w1_bf = w1_t.astype(jnp.bfloat16)
    b1_2d = b1.reshape(1, H).astype(jnp.float32)
    # Lane-dense fc2 weights: row 0 multiplies relu(h), row 1 multiplies relu(-h).
    w2_rows = w2_t.reshape(2, H).astype(jnp.float32)
    b2_1d = b2.reshape(1).astype(jnp.float32)

    # Batch tile: multiple of 8 sublanes; cap so tiny batches don't over-pad.
    tb = min(block_b, _round_up(B, 8))
    b_pad = _round_up(B, tb)
    if b_pad != B:
        x_bf = jnp.pad(x_bf, ((0, b_pad - B), (0, 0)))
    grid = (b_pad // tb,)

    out = pl.pallas_call(
        _nnue_kernel,
        out_shape=jax.ShapeDtypeStruct((b_pad, 1), jnp.float32),
        grid=grid,
        in_specs=[
            pl.BlockSpec((tb, IN), lambda i: (i, 0)),          # x streams per tile
            pl.BlockSpec((IN, H), lambda i: (0, 0)),           # W1 stays resident
            pl.BlockSpec((1, H), lambda i: (0, 0)),            # b1 stays resident
            pl.BlockSpec((2, H), lambda i: (0, 0)),            # w2 rows resident
            pl.BlockSpec(memory_space=pltpu.MemorySpace.SMEM), # b2 scalar
        ],
        out_specs=pl.BlockSpec((tb, 1), lambda i: (i, 0)),
        compiler_params=pltpu.CompilerParams(
            dimension_semantics=("parallel",)),
    )(x_bf, w1_bf, b1_2d, w2_rows, b2_1d)
    return out[:B]


def _init_params(key):
    """Deterministic init, uniform(-1/sqrt(fan_in), 1/sqrt(fan_in)) like torch."""
    k1, k2, k3, k4 = jax.random.split(key, 4)
    bnd1 = 1.0 / jnp.sqrt(768.0)
    bnd2 = 1.0 / jnp.sqrt(2048.0)
    # stored pre-transposed: [in, out]
    w1_t = jax.random.uniform(k1, (768, 1024), jnp.float32, -bnd1, bnd1)
    b1 = jax.random.uniform(k2, (1024,), jnp.float32, -bnd1, bnd1)
    w2_t = jax.random.uniform(k3, (2048, 1), jnp.float32, -bnd2, bnd2)
    b2 = jax.random.uniform(k4, (1,), jnp.float32, -bnd2, bnd2)
    return w1_t, b1, w2_t, b2


def _reference(x, w1_t, b1, w2_t, b2):
    # Matches the kernel's bf16 rounding of the fc1 operands (fp32 accumulation)
    # so the check isolates kernel correctness from the quantization choice.
    xq = x.astype(jnp.bfloat16).astype(jnp.float32)
    wq = w1_t.astype(jnp.bfloat16).astype(jnp.float32)
    h = xq @ wq + b1
    combined = jnp.concatenate([jnp.maximum(h, 0.0), jnp.maximum(-h, 0.0)], axis=1)
    return jax.nn.sigmoid(combined @ w2_t + b2)


if __name__ == "__main__":
    key = jax.random.PRNGKey(0)
    kx, kp = jax.random.split(key)

    B = 8
    x = jax.random.uniform(kx, (B, 768), jnp.float32)   # NNUE feature vector
    w1_t, b1, w2_t, b2 = _init_params(kp)

    out = chess_nnue_forward(x, w1_t, b1, w2_t, b2)
    out = jax.block_until_ready(out)

    ref = _reference(x, w1_t, b1, w2_t, b2)
    assert out.shape == (B, 1)
    assert jnp.allclose(out, ref, atol=1e-4, rtol=1e-4), (
        float(jnp.max(jnp.abs(out - ref))))

    print("KERNEL_OK")
</pallas_src>

<mosaic_0001>
module attributes {stable_mosaic.version = 11 : i64} {
  func.func @_nnue_kernel(%arg0: i32, %arg1: memref<8x768xbf16, #tpu.memory_space<vmem>>, %arg2: memref<768x1024xbf16, #tpu.memory_space<vmem>>, %arg3: memref<1x1024xf32, #tpu.memory_space<vmem>>, %arg4: memref<2x1024xf32, #tpu.memory_space<vmem>>, %arg5: memref<1xf32, #tpu.memory_space<smem>>, %arg6: memref<8x1xf32, #tpu.memory_space<vmem>>) attributes {dimension_semantics = [#tpu.dimension_semantics<parallel>], iteration_bounds = array<i64: 1>, scalar_prefetch = 0 : i64, scratch_operands = 0 : i64, tpu.core_type = #tpu.core_type<tc>, window_params = [{transform_indices = @transform_0, window_bounds = array<i64: 8, 768>}, {pipeline_mode = #tpu.pipeline_mode<synchronous>, transform_indices = @transform_1, window_bounds = array<i64: 768, 1024>}, {pipeline_mode = #tpu.pipeline_mode<synchronous>, transform_indices = @transform_2, window_bounds = array<i64: 1, 1024>}, {pipeline_mode = #tpu.pipeline_mode<synchronous>, transform_indices = @transform_3, window_bounds = array<i64: 2, 1024>}, {transform_indices = @transform_4, window_bounds = array<i64: 1>}, {transform_indices = @transform_5, window_bounds = array<i64: 8, 1>}]} {
    %c0 = arith.constant 0 : index
    %c0_0 = arith.constant 0 : index
    %0 = vector.load %arg1[%c0, %c0_0] : memref<8x768xbf16, #tpu.memory_space<vmem>>, vector<8x768xbf16>
    %c0_1 = arith.constant 0 : index
    %c0_2 = arith.constant 0 : index
    %1 = vector.load %arg2[%c0_1, %c0_2] : memref<768x1024xbf16, #tpu.memory_space<vmem>>, vector<768x1024xbf16>
    %cst = arith.constant dense<0.000000e+00> : vector<8x1024xf32>
    %2 = tpu.matmul %0, %1, %cst {dimension_numbers = #tpu.dot_dimension_numbers<[1], [0], [0], [1], [0, 0, 1, 1], [], []>} : vector<8x768xbf16>, vector<768x1024xbf16>, vector<8x1024xf32> -> vector<8x1024xf32>
    %c0_3 = arith.constant 0 : index
    %c0_4 = arith.constant 0 : index
    %3 = vector.load %arg3[%c0_3, %c0_4] : memref<1x1024xf32, #tpu.memory_space<vmem>>, vector<1x1024xf32>
    %4 = vector.broadcast %3 : vector<1x1024xf32> to vector<8x1024xf32>
    %5 = arith.addf %2, %4 : vector<8x1024xf32>
    %c0_5 = arith.constant 0 : index
    %c0_6 = arith.constant 0 : index
    %6 = vector.load %arg4[%c0_5, %c0_6] : memref<2x1024xf32, #tpu.memory_space<vmem>>, vector<1x1024xf32>
    %c1 = arith.constant 1 : index
    %c0_7 = arith.constant 0 : index
    %7 = vector.load %arg4[%c1, %c0_7] : memref<2x1024xf32, #tpu.memory_space<vmem>>, vector<1x1024xf32>
    %cst_8 = arith.constant 0.000000e+00 : f32
    %8 = vector.broadcast %cst_8 : f32 to vector<8x1024xf32>
    %9 = arith.cmpf ogt, %5, %8 : vector<8x1024xf32>
    %cst_9 = arith.constant 0.000000e+00 : f32
    %10 = vector.broadcast %cst_9 : f32 to vector<1x1024xf32>
    %11 = arith.subf %10, %7 : vector<1x1024xf32>
    %12 = vector.shape_cast %6 : vector<1x1024xf32> to vector<1x1024xf32>
    %13 = vector.broadcast %12 : vector<1x1024xf32> to vector<8x1024xf32>
    %14 = vector.shape_cast %11 : vector<1x1024xf32> to vector<1x1024xf32>
    %15 = vector.broadcast %14 : vector<1x1024xf32> to vector<8x1024xf32>
    %16 = arith.select %9, %13, %15 : vector<8x1024xi1>, vector<8x1024xf32>
    %17 = arith.mulf %5, %16 : vector<8x1024xf32>
    %cst_10 = arith.constant dense<0.000000e+00> : vector<8xf32>
    %18 = vector.multi_reduction <add>, %17, %cst_10 [1] : vector<8x1024xf32> to vector<8xf32>
    %19 = vector.shape_cast %18 : vector<8xf32> to vector<8x1xf32>
    %c0_11 = arith.constant 0 : index
    %20 = memref.load %arg5[%c0_11] : memref<1xf32, #tpu.memory_space<smem>>
    %21 = vector.broadcast %20 : f32 to vector<8x1xf32>
    %22 = arith.addf %19, %21 : vector<8x1xf32>
    %cst_12 = arith.constant 0.000000e+00 : f32
    %23 = vector.broadcast %cst_12 : f32 to vector<8x1xf32>
    %24 = arith.subf %23, %22 : vector<8x1xf32>
    %25 = math.exp %24 : vector<8x1xf32>
    %cst_13 = arith.constant 1.000000e+00 : f32
    %26 = vector.broadcast %cst_13 : f32 to vector<8x1xf32>
    %27 = arith.addf %26, %25 : vector<8x1xf32>
    %cst_14 = arith.constant 1.000000e+00 : f32
    %28 = vector.broadcast %cst_14 : f32 to vector<8x1xf32>
    %29 = arith.divf %28, %27 : vector<8x1xf32>
    %c0_15 = arith.constant 0 : index
    %c0_16 = arith.constant 0 : index
    %30 = vector.load %arg6[%c0_15, %c0_16] : memref<8x1xf32, #tpu.memory_space<vmem>>, vector<8x1xf32>
    tpu.vector_store %arg6[%c0_15, %c0_16], %29 {strides = array<i32>} : memref<8x1xf32, #tpu.memory_space<vmem>>, vector<8x1xf32>,
    return
  }
  func.func @transform_0(%arg0: i32) -> (i32, i32) {
    %c0_i32 = arith.constant 0 : i32
    %c0_i32_0 = arith.constant 0 : i32
    return %arg0, %c0_i32 : i32, i32
  }
  func.func @transform_1(%arg0: i32) -> (i32, i32) {
    %c0_i32 = arith.constant 0 : i32
    %c0_i32_0 = arith.constant 0 : i32
    %c0_i32_1 = arith.constant 0 : i32
    return %c0_i32, %c0_i32_0 : i32, i32
  }
  func.func @transform_2(%arg0: i32) -> (i32, i32) {
    %c0_i32 = arith.constant 0 : i32
    %c0_i32_0 = arith.constant 0 : i32
    %c0_i32_1 = arith.constant 0 : i32
    return %c0_i32, %c0_i32_0 : i32, i32
  }
  func.func @transform_3(%arg0: i32) -> (i32, i32) {
    %c0_i32 = arith.constant 0 : i32
    %c0_i32_0 = arith.constant 0 : i32
    %c0_i32_1 = arith.constant 0 : i32
    return %c0_i32, %c0_i32_0 : i32, i32
  }
  func.func @transform_4(%arg0: i32) -> i32 {
    %c0_i32 = arith.constant 0 : i32
    %c0_i32_0 = arith.constant 0 : i32
    return %c0_i32 : i32
  }
  func.func @transform_5(%arg0: i32) -> (i32, i32) {
    %c0_i32 = arith.constant 0 : i32
    %c0_i32_0 = arith.constant 0 : i32
    return %arg0, %c0_i32 : i32, i32
  }
}

</mosaic_0001>

<bundles_post_ra>
// kernel: chess_nnue_forward.1
= control target key start
LH: loop header
LB: loop body
LE: loop exit
PB: predicated region body
PF: predicated region fallthrough
CT: control target
= control target key end

     0   :  { %vm3011_vm8 = vcmask 7168   ;;  %s4748_s1 = inlined_call_operand.vmem [shape: bf16[768,1024], index: 1, kind: input, shape index: {}]   ;;  %s4749_s0 = inlined_call_operand.vmem [shape: bf16[8,768], index: 0, kind: input, shape index: {}]   ;;  %s4750_s3 = inlined_call_operand.vmem [shape: f32[2,1024], index: 3, kind: input, shape index: {}]   ;;  %s4751_s2 = inlined_call_operand.vmem [shape: f32[1,1024], index: 2, kind: input, shape index: {}]   ;;  %s4752_s4 = inlined_call_operand.<no memory space> [shape: f32[1], index: 4, kind: input, shape index: {}]   ;;  %s4753_s5 = inlined_call_operand.vmem [shape: f32[8,1], index: 5, kind: output, shape index: {}]  }
   0x1   :  { %v24_v0 = vld [vmem:[%s4748_s1] sm:$0xff]  ;;  %v25_v2 = vld [vmem:[%s4748_s1 + $0x8] sm:$0xff] }
   0x2   :  { %v28_v1 = vld [vmem:[%s4748_s1 + $0x20] sm:$0xff]  ;;  %v29_v4 = vld [vmem:[%s4748_s1 + $0x28] sm:$0xff] }
   0x3   :  { %v3024_v3 = vcombine.high %v24_v0, %v28_v1  ;;  %v3023_v5 = vcombine.low %v24_v0, %v28_v1  ;;  %v32_v6 = vld [vmem:[%s4748_s1 + $0x40] sm:$0xff]  ;;  %v3026_v8 = vcombine.high %v25_v2, %v29_v4  ;;  %v3025_v9 = vcombine.low %v25_v2, %v29_v4  ;;  %v33_v11 = vld [vmem:[%s4748_s1 + $0x48] sm:$0xff] }
   0x4   :  { %v36_v7 = vld [vmem:[%s4748_s1 + $0x60] sm:$0xff]  ;;  %v37_v12 = vld [vmem:[%s4748_s1 + $0x68] sm:$0xff] }
   0x5   :  { %v3032_v10 = vcombine.high %v32_v6, %v36_v7  ;;  %v40_v13 = vld [vmem:[%s4748_s1 + $0x80] sm:$0xff]  ;;  %2391 = vmatprep.subr.bf16.mxu0 %v3024_v3  ;;  %v3034_v14 = vcombine.high %v33_v11, %v37_v12  ;;  %v41_v16 = vld [vmem:[%s4748_s1 + $0x88] sm:$0xff]  ;;  %2514 = vmatprep.subr.bf16.mxu1 %v3026_v8  ;;  %v3031_v18 = vcombine.low %v32_v6, %v36_v7 }
   0x6   :  { %v44_v15 = vld [vmem:[%s4748_s1 + $0xa0] sm:$0xff]  ;;  %v45_v17 = vld [vmem:[%s4748_s1 + $0xa8] sm:$0xff]  ;;  %2392 = vmatpush1.bf16.msra.mxu0 %v3023_v5  ;;  %2515 = vmatpush1.bf16.msra.mxu1 %v3025_v9  ;;  %v3033_v19 = vcombine.low %v33_v11, %v37_v12 }
   0x7   :  { %2393 = vmatprep.subr.bf16.mxu0 %v3032_v10  ;;  %v3040_v20 = vcombine.high %v40_v13, %v44_v15  ;;  %2516 = vmatprep.subr.bf16.mxu1 %v3034_v14  ;;  %v3042_v21 = vcombine.high %v41_v16, %v45_v17  ;;  %v48_v22 = vld [vmem:[%s4748_s1 + $0xc0] sm:$0xff]  ;;  %v49_v24 = vld [vmem:[%s4748_s1 + $0xc8] sm:$0xff]  ;;  %v3039_v26 = vcombine.low %v40_v13, %v44_v15 }
   0x8   :  { %v52_v23 = vld [vmem:[%s4748_s1 + $0xe0] sm:$0xff]  ;;  %v53_v25 = vld [vmem:[%s4748_s1 + $0xe8] sm:$0xff]  ;;  %v3041_v27 = vcombine.low %v41_v16, %v45_v17 }
   0x9   :  { %v3048_v28 = vcombine.high %v48_v22, %v52_v23  ;;  %v3050_v29 = vcombine.high %v49_v24, %v53_v25  ;;  %v56_v30 = vld [vmem:[%s4748_s1 + $0x100] sm:$0xff]  ;;  %v57_v32 = vld [vmem:[%s4748_s1 + $0x108] sm:$0xff]  ;;  %v3047_v34 = vcombine.low %v48_v22, %v52_v23  ;;  %v3049_v35 = vcombine.low %v49_v24, %v53_v25 }
   0xa   :  { %2394 = vmatpush1.bf16.msra.mxu0 %v3031_v18  ;;  %2517 = vmatpush1.bf16.msra.mxu1 %v3033_v19  ;;  %v60_v31 = vld [vmem:[%s4748_s1 + $0x120] sm:$0xff]  ;;  %v61_v33 = vld [vmem:[%s4748_s1 + $0x128] sm:$0xff] }
   0xb   :  { %2395 = vmatprep.subr.bf16.mxu0 %v3040_v20  ;;  %2518 = vmatprep.subr.bf16.mxu1 %v3042_v21  ;;  %v3056_v36 = vcombine.high %v56_v30, %v60_v31  ;;  %v3058_v37 = vcombine.high %v57_v32, %v61_v33  ;;  %v64_v38 = vld [vmem:[%s4748_s1 + $0x140] sm:$0xff]  ;;  %v65_v40 = vld [vmem:[%s4748_s1 + $0x148] sm:$0xff]  ;;  %v3055_v42 = vcombine.low %v56_v30, %v60_v31 }
   0xc   :  { %v68_v39 = vld [vmem:[%s4748_s1 + $0x160] sm:$0xff]  ;;  %v69_v41 = vld [vmem:[%s4748_s1 + $0x168] sm:$0xff]  ;;  %v3057_v43 = vcombine.low %v57_v32, %v61_v33 }
   0xd   :  { %v3064_v44 = vcombine.high %v64_v38, %v68_v39  ;;  %v3066_v45 = vcombine.high %v65_v40, %v69_v41  ;;  %v72_v46 = vld [vmem:[%s4748_s1 + $0x180] sm:$0xff]  ;;  %v73_v48 = vld [vmem:[%s4748_s1 + $0x188] sm:$0xff]  ;;  %v3063_v50 = vcombine.low %v64_v38, %v68_v39  ;;  %v3065_v51 = vcombine.low %v65_v40, %v69_v41 }
   0xe   :  { %2396 = vmatpush1.bf16.msra.mxu0 %v3039_v26  ;;  %2519 = vmatpush1.bf16.msra.mxu1 %v3041_v27  ;;  %v76_v47 = vld [vmem:[%s4748_s1 + $0x1a0] sm:$0xff]  ;;  %v77_v49 = vld [vmem:[%s4748_s1 + $0x1a8] sm:$0xff] }
   0xf   :  { %2397 = vmatprep.subr.bf16.mxu0 %v3048_v28  ;;  %2520 = vmatprep.subr.bf16.mxu1 %v3050_v29  ;;  %v3072_v52 = vcombine.high %v72_v46, %v76_v47  ;;  %v3575_v53 = vld [vmem:[%s4749_s0] sm:$0xff]  ;;  %v3074_v54 = vcombine.high %v73_v48, %v77_v49  ;;  %v81_v58 = vld [vmem:[%s4748_s1 + $0x1c8] sm:$0xff]  ;;  %v3071_v60 = vcombine.low %v72_v46, %v76_v47 }
  0x10   :  { %v80_v55 = vld [vmem:[%s4748_s1 + $0x1c0] sm:$0xff]  ;;  %v3585_v57 = vcombine.high %v3575_v53, %v3575_v53  ;;  %v85_v59 = vld [vmem:[%s4748_s1 + $0x1e8] sm:$0xff]  ;;  %v3073_v61 = vcombine.low %v73_v48, %v77_v49 }
  0x11   :  { %v84_v56 = vld [vmem:[%s4748_s1 + $0x1e0] sm:$0xff]  ;;  %v3082_v63 = vcombine.high %v81_v58, %v85_v59  ;;  %v89_v2 = vld [vmem:[%s4748_s1 + $0x208] sm:$0xff]  ;;  %v3081_v5 = vcombine.low %v81_v58, %v85_v59 }
  0x12   :  { %2398 = vmatpush1.bf16.msra.mxu0 %v3047_v34  ;;  %2521 = vmatpush1.bf16.msra.mxu1 %v3049_v35  ;;  %v3080_v62 = vcombine.high %v80_v55, %v84_v56  ;;  %v88_v0 = vld [vmem:[%s4748_s1 + $0x200] sm:$0xff]  ;;  %v93_v3 = vld [vmem:[%s4748_s1 + $0x228] sm:$0xff]  ;;  %v3079_v4 = vcombine.low %v80_v55, %v84_v56 }
  0x13   :  { %2399 = vmatprep.subr.bf16.mxu0 %v3056_v36  ;;  %2522 = vmatprep.subr.bf16.mxu1 %v3058_v37  ;;  %v92_v1 = vld [vmem:[%s4748_s1 + $0x220] sm:$0xff]  ;;  %v3090_v7 = vcombine.high %v89_v2, %v93_v3  ;;  %v97_v10 = vld [vmem:[%s4748_s1 + $0x248] sm:$0xff]  ;;  %v3089_v13 = vcombine.low %v89_v2, %v93_v3 }
  0x14   :  { %2423 = vmatprep.mubr.bf16.mxu0 %v3585_v57  ;;  %2546 = vmatprep.mubr.bf16.mxu1 %v3585_v57  ;;  %v3088_v6 = vcombine.high %v88_v0, %v92_v1  ;;  %v96_v8 = vld [vmem:[%s4748_s1 + $0x240] sm:$0xff]  ;;  %v101_v11 = vld [vmem:[%s4748_s1 + $0x268] sm:$0xff]  ;;  %v3087_v12 = vcombine.low %v88_v0, %v92_v1 }
  0x15   :  { %v100_v9 = vld [vmem:[%s4748_s1 + $0x260] sm:$0xff]  ;;  %v3098_v15 = vcombine.high %v97_v10, %v101_v11  ;;  %v105_v18 = vld [vmem:[%s4748_s1 + $0x288] sm:$0xff]  ;;  %v3097_v21 = vcombine.low %v97_v10, %v101_v11 }
  0x16   :  { %2400 = vmatpush1.bf16.msra.mxu0 %v3055_v42  ;;  %2523 = vmatpush1.bf16.msra.mxu1 %v3057_v43  ;;  %v3096_v14 = vcombine.high %v96_v8, %v100_v9  ;;  %v104_v16 = vld [vmem:[%s4748_s1 + $0x280] sm:$0xff]  ;;  %v109_v19 = vld [vmem:[%s4748_s1 + $0x2a8] sm:$0xff]  ;;  %v3095_v20 = vcombine.low %v96_v8, %v100_v9 }
  0x17   :  { %2401 = vmatprep.subr.bf16.mxu0 %v3064_v44  ;;  %2524 = vmatprep.subr.bf16.mxu1 %v3066_v45  ;;  %v108_v17 = vld [vmem:[%s4748_s1 + $0x2a0] sm:$0xff]  ;;  %v3106_v23 = vcombine.high %v105_v18, %v109_v19  ;;  %v113_v26 = vld [vmem:[%s4748_s1 + $0x2c8] sm:$0xff]  ;;  %v3105_v29 = vcombine.low %v105_v18, %v109_v19 }
  0x18   :  { %v3104_v22 = vcombine.high %v104_v16, %v108_v17  ;;  %v112_v24 = vld [vmem:[%s4748_s1 + $0x2c0] sm:$0xff]  ;;  %v117_v27 = vld [vmem:[%s4748_s1 + $0x2e8] sm:$0xff]  ;;  %v3103_v28 = vcombine.low %v104_v16, %v108_v17 }
  0x19   :  { %v116_v25 = vld [vmem:[%s4748_s1 + $0x2e0] sm:$0xff]  ;;  %v3114_v31 = vcombine.high %v113_v26, %v117_v27  ;;  %v121_v34 = vld [vmem:[%s4748_s1 + $0x308] sm:$0xff]  ;;  %v3113_v37 = vcombine.low %v113_v26, %v117_v27 }
  0x1a   :  { %2402 = vmatpush1.bf16.msra.mxu0 %v3063_v50  ;;  %2525 = vmatpush1.bf16.msra.mxu1 %v3065_v51  ;;  %v3112_v30 = vcombine.high %v112_v24, %v116_v25  ;;  %v120_v32 = vld [vmem:[%s4748_s1 + $0x300] sm:$0xff]  ;;  %v125_v35 = vld [vmem:[%s4748_s1 + $0x328] sm:$0xff]  ;;  %v3111_v36 = vcombine.low %v112_v24, %v116_v25 }
  0x1b   :  { %2403 = vmatprep.subr.bf16.mxu0 %v3072_v52  ;;  %2526 = vmatprep.subr.bf16.mxu1 %v3074_v54  ;;  %v124_v33 = vld [vmem:[%s4748_s1 + $0x320] sm:$0xff]  ;;  %v3122_v39 = vcombine.high %v121_v34, %v125_v35  ;;  %v129_v42 = vld [vmem:[%s4748_s1 + $0x348] sm:$0xff]  ;;  %v3121_v45 = vcombine.low %v121_v34, %v125_v35 }
  0x1c   :  { %v3120_v38 = vcombine.high %v120_v32, %v124_v33  ;;  %v128_v40 = vld [vmem:[%s4748_s1 + $0x340] sm:$0xff]  ;;  %v133_v43 = vld [vmem:[%s4748_s1 + $0x368] sm:$0xff]  ;;  %v3119_v44 = vcombine.low %v120_v32, %v124_v33 }
  0x1d   :  { %v132_v41 = vld [vmem:[%s4748_s1 + $0x360] sm:$0xff]  ;;  %v3130_v47 = vcombine.high %v129_v42, %v133_v43  ;;  %v137_v50 = vld [vmem:[%s4748_s1 + $0x388] sm:$0xff]  ;;  %v3129_v54 = vcombine.low %v129_v42, %v133_v43 }
  0x1e   :  { %2404 = vmatpush1.bf16.msra.mxu0 %v3071_v60  ;;  %2527 = vmatpush1.bf16.msra.mxu1 %v3073_v61  ;;  %v3128_v46 = vcombine.high %v128_v40, %v132_v41  ;;  %v136_v48 = vld [vmem:[%s4748_s1 + $0x380] sm:$0xff]  ;;  %v141_v51 = vld [vmem:[%s4748_s1 + $0x3a8] sm:$0xff]  ;;  %v3127_v52 = vcombine.low %v128_v40, %v132_v41 }
  0x1f   :  { %2405 = vmatprep.subr.bf16.mxu0 %v3080_v62  ;;  %2528 = vmatprep.subr.bf16.mxu1 %v3082_v63  ;;  %v140_v49 = vld [vmem:[%s4748_s1 + $0x3a0] sm:$0xff]  ;;  %v3138_v56 = vcombine.high %v137_v50, %v141_v51  ;;  %v145_v60 = vld [vmem:[%s4748_s1 + $0x3c8] sm:$0xff]  ;;  %v3137_v63 = vcombine.low %v137_v50, %v141_v51 }
  0x20   :  { %v3136_v55 = vcombine.high %v136_v48, %v140_v49  ;;  %v144_v58 = vld [vmem:[%s4748_s1 + $0x3c0] sm:$0xff]  ;;  %v149_v61 = vld [vmem:[%s4748_s1 + $0x3e8] sm:$0xff]  ;;  %v3135_v62 = vcombine.low %v136_v48, %v140_v49 }
  0x21   :  { %v148_v59 = vld [vmem:[%s4748_s1 + $0x3e0] sm:$0xff]  ;;  %v3146_v1 = vcombine.high %v145_v60, %v149_v61 }
  0x22   :  { %2406 = vmatpush1.bf16.msra.mxu0 %v3079_v4  ;;  %2529 = vmatpush1.bf16.msra.mxu1 %v3081_v5  ;;  %v3144_v0 = vcombine.high %v144_v58, %v148_v59  ;;  %v152_v2 = vld [vmem:[%s4748_s1 + $0x400] sm:$0xff]  ;;  %v153_v4 = vld [vmem:[%s4748_s1 + $0x408] sm:$0xff] }
  0x23   :  { %2407 = vmatprep.subr.bf16.mxu0 %v3088_v6  ;;  %2530 = vmatprep.subr.bf16.mxu1 %v3090_v7  ;;  %v156_v3 = vld [vmem:[%s4748_s1 + $0x420] sm:$0xff]  ;;  %v157_v5 = vld [vmem:[%s4748_s1 + $0x428] sm:$0xff]  ;;  %v3143_v6 = vcombine.low %v144_v58, %v148_v59  ;;  %v3145_v7 = vcombine.low %v145_v60, %v149_v61 }
  0x24   :  { %v3152_v8 = vcombine.high %v152_v2, %v156_v3  ;;  %v3154_v9 = vcombine.high %v153_v4, %v157_v5  ;;  %v160_v10 = vld [vmem:[%s4748_s1 + $0x440] sm:$0xff]  ;;  %v3151_v16 = vcombine.low %v152_v2, %v156_v3  ;;  %v3153_v17 = vcombine.low %v153_v4, %v157_v5 }
  0x25   :  { %v164_v11 = vld [vmem:[%s4748_s1 + $0x460] sm:$0xff] }
  0x26   :  { %2408 = vmatpush1.bf16.msra.mxu0 %v3087_v12  ;;  %2531 = vmatpush1.bf16.msra.mxu1 %v3089_v13  ;;  %v3711_v12 = vcombine.low %v3575_v53, %v3575_v53  ;;  %v161_v13 = vld [vmem:[%s4748_s1 + $0x448] sm:$0xff]  ;;  %v3160_v53 = vcombine.high %v160_v10, %v164_v11  ;;  %v168_v19 = vld [vmem:[%s4748_s1 + $0x480] sm:$0xff]  ;;  %v3159_v24 = vcombine.low %v160_v10, %v164_v11 }
  0x27   :  { %2409 = vmatprep.subr.bf16.mxu0 %v3096_v14  ;;  %2532 = vmatprep.subr.bf16.mxu1 %v3098_v15  ;;  %v165_v14 = vld [vmem:[%s4748_s1 + $0x468] sm:$0xff] }
  0x28   :  { %v3722_v15 = vld [vmem:[%s4749_s0 + $0x8] sm:$0xff]  ;;  %v3162_v18 = vcombine.high %v161_v13, %v165_v14  ;;  %v3161_v25 = vcombine.low %v161_v13, %v165_v14 }
  0x2a   :  { %2410 = vmatpush1.bf16.msra.mxu0 %v3095_v20  ;;  %2533 = vmatpush1.bf16.msra.mxu1 %v3097_v21  ;;  %v172_v20 = vld [vmem:[%s4748_s1 + $0x4a0] sm:$0xff]  ;;  %v3732_v21 = vcombine.high %v3722_v15, %v3722_v15 }
  0x2b   :  { %2411 = vmatprep.subr.bf16.mxu0 %v3104_v22  ;;  %2534 = vmatprep.subr.bf16.mxu1 %v3106_v23  ;;  %v169_v22 = vld [vmem:[%s4748_s1 + $0x488] sm:$0xff]  ;;  %v3168_v26 = vcombine.high %v168_v19, %v172_v20  ;;  %v3167_v32 = vcombine.low %v168_v19, %v172_v20 }
  0x2c   :  { %v173_v23 = vld [vmem:[%s4748_s1 + $0x4a8] sm:$0xff] }
  0x2d   :  { %v3170_v27 = vcombine.high %v169_v22, %v173_v23  ;;  %v3169_v33 = vcombine.low %v169_v22, %v173_v23 }
  0x2e   :  { %2412 = vmatpush1.bf16.msra.mxu0 %v3103_v28  ;;  %2535 = vmatpush1.bf16.msra.mxu1 %v3105_v29  ;;  %v176_v28 = vld [vmem:[%s4748_s1 + $0x4c0] sm:$0xff] }
  0x2f   :  { %2413 = vmatprep.subr.bf16.mxu0 %v3112_v30  ;;  %2536 = vmatprep.subr.bf16.mxu1 %v3114_v31  ;;  %v180_v29 = vld [vmem:[%s4748_s1 + $0x4e0] sm:$0xff]  ;;  %v177_v30 = vld [vmem:[%s4748_s1 + $0x4c8] sm:$0xff] }
  0x30   :  { %v181_v31 = vld [vmem:[%s4748_s1 + $0x4e8] sm:$0xff]  ;;  %v3176_v34 = vcombine.high %v176_v28, %v180_v29  ;;  %v3175_v40 = vcombine.low %v176_v28, %v180_v29 }
  0x31   :  { %v3178_v35 = vcombine.high %v177_v30, %v181_v31  ;;  %v3177_v41 = vcombine.low %v177_v30, %v181_v31 }
  0x32   :  { %2414 = vmatpush1.bf16.msra.mxu0 %v3111_v36  ;;  %2537 = vmatpush1.bf16.msra.mxu1 %v3113_v37  ;;  %v184_v36 = vld [vmem:[%s4748_s1 + $0x500] sm:$0xff] }
  0x33   :  { %2415 = vmatprep.subr.bf16.mxu0 %v3120_v38  ;;  %2538 = vmatprep.subr.bf16.mxu1 %v3122_v39  ;;  %v188_v37 = vld [vmem:[%s4748_s1 + $0x520] sm:$0xff]  ;;  %v185_v38 = vld [vmem:[%s4748_s1 + $0x508] sm:$0xff] }
  0x34   :  { %v189_v39 = vld [vmem:[%s4748_s1 + $0x528] sm:$0xff]  ;;  %v3184_v42 = vcombine.high %v184_v36, %v188_v37  ;;  %v3183_v48 = vcombine.low %v184_v36, %v188_v37 }
  0x35   :  { %v3186_v43 = vcombine.high %v185_v38, %v189_v39  ;;  %v3185_v49 = vcombine.low %v185_v38, %v189_v39 }
  0x36   :  { %2416 = vmatpush1.bf16.msra.mxu0 %v3119_v44  ;;  %2539 = vmatpush1.bf16.msra.mxu1 %v3121_v45  ;;  %v192_v44 = vld [vmem:[%s4748_s1 + $0x540] sm:$0xff] }
  0x37   :  { %2417 = vmatprep.subr.bf16.mxu0 %v3128_v46  ;;  %2540 = vmatprep.subr.bf16.mxu1 %v3130_v47  ;;  %v196_v45 = vld [vmem:[%s4748_s1 + $0x560] sm:$0xff]  ;;  %v193_v46 = vld [vmem:[%s4748_s1 + $0x548] sm:$0xff] }
  0x38   :  { %v197_v47 = vld [vmem:[%s4748_s1 + $0x568] sm:$0xff]  ;;  %v3192_v50 = vcombine.high %v192_v44, %v196_v45  ;;  %v3191_v58 = vcombine.low %v192_v44, %v196_v45 }
  0x39   :  { %v3194_v51 = vcombine.high %v193_v46, %v197_v47  ;;  %v3193_v59 = vcombine.low %v193_v46, %v197_v47 }
  0x3a   :  { %2418 = vmatpush1.bf16.msra.mxu0 %v3127_v52  ;;  %2541 = vmatpush1.bf16.msra.mxu1 %v3129_v54  ;;  %v200_v52 = vld [vmem:[%s4748_s1 + $0x580] sm:$0xff] }
  0x3b   :  { %2419 = vmatprep.subr.bf16.mxu0 %v3136_v55  ;;  %2542 = vmatprep.subr.bf16.mxu1 %v3138_v56  ;;  %v204_v54 = vld [vmem:[%s4748_s1 + $0x5a0] sm:$0xff]  ;;  %v201_v55 = vld [vmem:[%s4748_s1 + $0x588] sm:$0xff] }
  0x3c   :  { %v205_v56 = vld [vmem:[%s4748_s1 + $0x5a8] sm:$0xff]  ;;  %v3200_v60 = vcombine.high %v200_v52, %v204_v54  ;;  %v3199_v2 = vcombine.low %v200_v52, %v204_v54 }
  0x3d   :  { %v3202_v61 = vcombine.high %v201_v55, %v205_v56  ;;  %v3201_v3 = vcombine.low %v201_v55, %v205_v56 }
  0x3e   :  { %2420 = vmatpush1.bf16.msra.mxu0 %v3135_v62  ;;  %2543 = vmatpush1.bf16.msra.mxu1 %v3137_v63  ;;  %v208_v62 = vld [vmem:[%s4748_s1 + $0x5c0] sm:$0xff] }
  0x3f   :  { %2421 = vmatprep.subr.bf16.mxu0 %v3144_v0  ;;  %2544 = vmatprep.subr.bf16.mxu1 %v3146_v1  ;;  %v212_v63 = vld [vmem:[%s4748_s1 + $0x5e0] sm:$0xff]  ;;  %v209_v0 = vld [vmem:[%s4748_s1 + $0x5c8] sm:$0xff] }
  0x40   :  { %v213_v1 = vld [vmem:[%s4748_s1 + $0x5e8] sm:$0xff]  ;;  %v3208_v4 = vcombine.high %v208_v62, %v212_v63  ;;  %v3207_v10 = vcombine.low %v208_v62, %v212_v63 }
  0x41   :  { %v3210_v5 = vcombine.high %v209_v0, %v213_v1  ;;  %v3209_v11 = vcombine.low %v209_v0, %v213_v1 }
  0x42   :  { %2422 = vmatpush1.bf16.msra.mxu0 %v3143_v6  ;;  %2545 = vmatpush1.bf16.msra.mxu1 %v3145_v7  ;;  %v216_v6 = vld [vmem:[%s4748_s1 + $0x600] sm:$0xff] }
  0x43   :  { %2432 = vmatprep.subr.bf16.mxu0 %v3152_v8  ;;  %2555 = vmatprep.subr.bf16.mxu1 %v3154_v9  ;;  %v220_v7 = vld [vmem:[%s4748_s1 + $0x620] sm:$0xff]  ;;  %v217_v8 = vld [vmem:[%s4748_s1 + $0x608] sm:$0xff] }
  0x44   :  { %v221_v9 = vld [vmem:[%s4748_s1 + $0x628] sm:$0xff]  ;;  %v3216_v13 = vcombine.high %v216_v6, %v220_v7  ;;  %v3215_v19 = vcombine.low %v216_v6, %v220_v7 }
  0x45   :  { %2424 = vmatmul.mubr.bf16.vlgmr.msra.gmra.mrb[0].mxu0 %v3711_v12  ;;  %2547 = vmatmul.mubr.bf16.vlgmr.msra.gmra.mrb[0].mxu1 %v3711_v12  ;;  %v3218_v14 = vcombine.high %v217_v8, %v221_v9  ;;  %v3217_v20 = vcombine.low %v217_v8, %v221_v9 }
  0x46   :  { %2433 = vmatpush1.bf16.msra.mxu0 %v3151_v16  ;;  %2556 = vmatpush1.bf16.msra.mxu1 %v3153_v17  ;;  %v224_v16 = vld [vmem:[%s4748_s1 + $0x640] sm:$0xff] }
  0x47   :  { %2434 = vmatprep.subr.bf16.mxu0 %v3160_v53  ;;  %2557 = vmatprep.subr.bf16.mxu1 %v3162_v18  ;;  %v228_v17 = vld [vmem:[%s4748_s1 + $0x660] sm:$0xff]  ;;  %v225_v53 = vld [vmem:[%s4748_s1 + $0x648] sm:$0xff] }
  0x48   :  { %2464 = vmatprep.mubr.bf16.mxu0 %v3732_v21  ;;  %2587 = vmatprep.mubr.bf16.mxu1 %v3732_v21  ;;  %v229_v18 = vld [vmem:[%s4748_s1 + $0x668] sm:$0xff]  ;;  %v3224_v22 = vcombine.high %v224_v16, %v228_v17  ;;  %v3223_v28 = vcombine.low %v224_v16, %v228_v17 }
  0x49   :  { %v3226_v23 = vcombine.high %v225_v53, %v229_v18  ;;  %v3225_v29 = vcombine.low %v225_v53, %v229_v18 }
  0x4a   :  { %2435 = vmatpush1.bf16.msra.mxu0 %v3159_v24  ;;  %2558 = vmatpush1.bf16.msra.mxu1 %v3161_v25  ;;  %v232_v24 = vld [vmem:[%s4748_s1 + $0x680] sm:$0xff] }
  0x4b   :  { %2436 = vmatprep.subr.bf16.mxu0 %v3168_v26  ;;  %2559 = vmatprep.subr.bf16.mxu1 %v3170_v27  ;;  %v236_v25 = vld [vmem:[%s4748_s1 + $0x6a0] sm:$0xff]  ;;  %v233_v26 = vld [vmem:[%s4748_s1 + $0x688] sm:$0xff] }
  0x4c   :  { %v237_v27 = vld [vmem:[%s4748_s1 + $0x6a8] sm:$0xff]  ;;  %v3232_v30 = vcombine.high %v232_v24, %v236_v25  ;;  %v3231_v36 = vcombine.low %v232_v24, %v236_v25  ;;  %v3931_v25 = vld [vmem:[%s4749_s0 + $0x10] sm:$0xff] }
  0x4d   :  { %v3234_v31 = vcombine.high %v233_v26, %v237_v27  ;;  %v3233_v37 = vcombine.low %v233_v26, %v237_v27  ;;  %v293_v24 = vld [vmem:[%s4748_s1 + $0x868] sm:$0xff] }
  0x4e   :  { %2437 = vmatpush1.bf16.msra.mxu0 %v3167_v32  ;;  %2560 = vmatpush1.bf16.msra.mxu1 %v3169_v33  ;;  %v240_v32 = vld [vmem:[%s4748_s1 + $0x6c0] sm:$0xff] }
  0x4f   :  { %2438 = vmatprep.subr.bf16.mxu0 %v3176_v34  ;;  %2561 = vmatprep.subr.bf16.mxu1 %v3178_v35  ;;  %v244_v33 = vld [vmem:[%s4748_s1 + $0x6e0] sm:$0xff]  ;;  %v241_v34 = vld [vmem:[%s4748_s1 + $0x6c8] sm:$0xff] }
  0x50   :  { %v245_v35 = vld [vmem:[%s4748_s1 + $0x6e8] sm:$0xff]  ;;  %v3240_v38 = vcombine.high %v240_v32, %v244_v33  ;;  %v3239_v44 = vcombine.low %v240_v32, %v244_v33 }
  0x51   :  { %v3242_v39 = vcombine.high %v241_v34, %v245_v35  ;;  %v3241_v45 = vcombine.low %v241_v34, %v245_v35  ;;  %v297_v32 = vld [vmem:[%s4748_s1 + $0x888] sm:$0xff] }
  0x52   :  { %2439 = vmatpush1.bf16.msra.mxu0 %v3175_v40  ;;  %2562 = vmatpush1.bf16.msra.mxu1 %v3177_v41  ;;  %v248_v40 = vld [vmem:[%s4748_s1 + $0x700] sm:$0xff]  ;;  %v301_v33 = vld [vmem:[%s4748_s1 + $0x8a8] sm:$0xff] }
  0x53   :  { %2440 = vmatprep.subr.bf16.mxu0 %v3184_v42  ;;  %2563 = vmatprep.subr.bf16.mxu1 %v3186_v43  ;;  %v252_v41 = vld [vmem:[%s4748_s1 + $0x720] sm:$0xff]  ;;  %v249_v42 = vld [vmem:[%s4748_s1 + $0x708] sm:$0xff] }
  0x54   :  { %v253_v43 = vld [vmem:[%s4748_s1 + $0x728] sm:$0xff]  ;;  %v3248_v46 = vcombine.high %v248_v40, %v252_v41  ;;  %v3247_v52 = vcombine.low %v248_v40, %v252_v41 }
  0x55   :  { %v3250_v47 = vcombine.high %v249_v42, %v253_v43  ;;  %v3249_v54 = vcombine.low %v249_v42, %v253_v43  ;;  %v305_v40 = vld [vmem:[%s4748_s1 + $0x8c8] sm:$0xff]  ;;  %v3297_v43 = vcombine.low %v297_v32, %v301_v33 }
  0x56   :  { %2441 = vmatpush1.bf16.msra.mxu0 %v3183_v48  ;;  %2564 = vmatpush1.bf16.msra.mxu1 %v3185_v49  ;;  %v256_v48 = vld [vmem:[%s4748_s1 + $0x740] sm:$0xff]  ;;  %v309_v41 = vld [vmem:[%s4748_s1 + $0x8e8] sm:$0xff] }
  0x57   :  { %2442 = vmatprep.subr.bf16.mxu0 %v3192_v50  ;;  %2565 = vmatprep.subr.bf16.mxu1 %v3194_v51  ;;  %v260_v49 = vld [vmem:[%s4748_s1 + $0x760] sm:$0xff]  ;;  %v257_v50 = vld [vmem:[%s4748_s1 + $0x748] sm:$0xff] }
  0x58   :  { %v261_v51 = vld [vmem:[%s4748_s1 + $0x768] sm:$0xff]  ;;  %v3256_v55 = vcombine.high %v256_v48, %v260_v49  ;;  %v3255_v62 = vcombine.low %v256_v48, %v260_v49 }
  0x59   :  { %v3258_v56 = vcombine.high %v257_v50, %v261_v51  ;;  %v3257_v63 = vcombine.low %v257_v50, %v261_v51  ;;  %v313_v48 = vld [vmem:[%s4748_s1 + $0x908] sm:$0xff]  ;;  %v3305_v51 = vcombine.low %v305_v40, %v309_v41 }
  0x5a   :  { %2443 = vmatpush1.bf16.msra.mxu0 %v3191_v58  ;;  %2566 = vmatpush1.bf16.msra.mxu1 %v3193_v59  ;;  %v264_v58 = vld [vmem:[%s4748_s1 + $0x780] sm:$0xff]  ;;  %v317_v49 = vld [vmem:[%s4748_s1 + $0x928] sm:$0xff] }
  0x5b   :  { %2444 = vmatprep.subr.bf16.mxu0 %v3200_v60  ;;  %2567 = vmatprep.subr.bf16.mxu1 %v3202_v61  ;;  %v268_v59 = vld [vmem:[%s4748_s1 + $0x7a0] sm:$0xff]  ;;  %v265_v60 = vld [vmem:[%s4748_s1 + $0x788] sm:$0xff] }
  0x5c   :  { %v269_v61 = vld [vmem:[%s4748_s1 + $0x7a8] sm:$0xff]  ;;  %v3264_v0 = vcombine.high %v264_v58, %v268_v59  ;;  %v3263_v6 = vcombine.low %v264_v58, %v268_v59 }
  0x5d   :  { %v3266_v1 = vcombine.high %v265_v60, %v269_v61  ;;  %v3265_v7 = vcombine.low %v265_v60, %v269_v61  ;;  %v321_v58 = vld [vmem:[%s4748_s1 + $0x948] sm:$0xff]  ;;  %v3313_v61 = vcombine.low %v313_v48, %v317_v49 }
  0x5e   :  { %2445 = vmatpush1.bf16.msra.mxu0 %v3199_v2  ;;  %2568 = vmatpush1.bf16.msra.mxu1 %v3201_v3  ;;  %v272_v2 = vld [vmem:[%s4748_s1 + $0x7c0] sm:$0xff]  ;;  %v325_v59 = vld [vmem:[%s4748_s1 + $0x968] sm:$0xff] }
  0x5f   :  { %2446 = vmatprep.subr.bf16.mxu0 %v3208_v4  ;;  %2569 = vmatprep.subr.bf16.mxu1 %v3210_v5  ;;  %v276_v3 = vld [vmem:[%s4748_s1 + $0x7e0] sm:$0xff]  ;;  %v273_v4 = vld [vmem:[%s4748_s1 + $0x7c8] sm:$0xff] }
  0x60   :  { %v277_v5 = vld [vmem:[%s4748_s1 + $0x7e8] sm:$0xff]  ;;  %v3272_v8 = vcombine.high %v272_v2, %v276_v3  ;;  %v3271_v16 = vcombine.low %v272_v2, %v276_v3 }
  0x61   :  { %v3274_v9 = vcombine.high %v273_v4, %v277_v5  ;;  %v3273_v17 = vcombine.low %v273_v4, %v277_v5  ;;  %v329_v2 = vld [vmem:[%s4748_s1 + $0x988] sm:$0xff]  ;;  %v3321_v5 = vcombine.low %v321_v58, %v325_v59 }
  0x62   :  { %2447 = vmatpush1.bf16.msra.mxu0 %v3207_v10  ;;  %2570 = vmatpush1.bf16.msra.mxu1 %v3209_v11  ;;  %v280_v10 = vld [vmem:[%s4748_s1 + $0x800] sm:$0xff]  ;;  %v333_v3 = vld [vmem:[%s4748_s1 + $0x9a8] sm:$0xff] }
  0x63   :  { %2448 = vmatprep.subr.bf16.mxu0 %v3216_v13  ;;  %2571 = vmatprep.subr.bf16.mxu1 %v3218_v14  ;;  %v284_v11 = vld [vmem:[%s4748_s1 + $0x820] sm:$0xff]  ;;  %v281_v13 = vld [vmem:[%s4748_s1 + $0x808] sm:$0xff] }
  0x64   :  { %v285_v14 = vld [vmem:[%s4748_s1 + $0x828] sm:$0xff]  ;;  %v3280_v53 = vcombine.high %v280_v10, %v284_v11  ;;  %v3279_v26 = vcombine.low %v280_v10, %v284_v11 }
  0x65   :  { %v3282_v18 = vcombine.high %v281_v13, %v285_v14  ;;  %v3281_v27 = vcombine.low %v281_v13, %v285_v14  ;;  %v337_v10 = vld [vmem:[%s4748_s1 + $0x9c8] sm:$0xff]  ;;  %v3329_v14 = vcombine.low %v329_v2, %v333_v3 }
  0x66   :  { %2449 = vmatpush1.bf16.msra.mxu0 %v3215_v19  ;;  %2572 = vmatpush1.bf16.msra.mxu1 %v3217_v20  ;;  %v288_v19 = vld [vmem:[%s4748_s1 + $0x840] sm:$0xff]  ;;  %v341_v11 = vld [vmem:[%s4748_s1 + $0x9e8] sm:$0xff] }
  0x67   :  { %2450 = vmatprep.subr.bf16.mxu0 %v3224_v22  ;;  %2573 = vmatprep.subr.bf16.mxu1 %v3226_v23  ;;  %v292_v20 = vld [vmem:[%s4748_s1 + $0x860] sm:$0xff]  ;;  %v3920_v22 = vcombine.low %v3722_v15, %v3722_v15  ;;  %v289_v23 = vld [vmem:[%s4748_s1 + $0x848] sm:$0xff] }
  0x68   :  { %v3288_v15 = vcombine.high %v288_v19, %v292_v20  ;;  %v3287_v34 = vcombine.low %v288_v19, %v292_v20  ;;  %v3289_v35 = vcombine.low %v289_v23, %v293_v24  ;;  %v345_v19 = vld [vmem:[%s4748_s1 + $0xa08] sm:$0xff] }
  0x69   :  { %v349_v20 = vld [vmem:[%s4748_s1 + $0xa28] sm:$0xff] }
  0x6a   :  { %2451 = vmatpush1.bf16.msra.mxu0 %v3223_v28  ;;  %2574 = vmatpush1.bf16.msra.mxu1 %v3225_v29  ;;  %v3290_v28 = vcombine.high %v289_v23, %v293_v24  ;;  %v296_v29 = vld [vmem:[%s4748_s1 + $0x880] sm:$0xff]  ;;  %v3337_v24 = vcombine.low %v337_v10, %v341_v11 }
  0x6b   :  { %2452 = vmatprep.subr.bf16.mxu0 %v3232_v30  ;;  %2575 = vmatprep.subr.bf16.mxu1 %v3234_v31  ;;  %v300_v30 = vld [vmem:[%s4748_s1 + $0x8a0] sm:$0xff]  ;;  %v3941_v31 = vcombine.high %v3931_v25, %v3931_v25 }
  0x6c   :  { %v3295_v42 = vcombine.low %v296_v29, %v300_v30 }
  0x6e   :  { %2453 = vmatpush1.bf16.msra.mxu0 %v3231_v36  ;;  %2576 = vmatpush1.bf16.msra.mxu1 %v3233_v37  ;;  %v3296_v36 = vcombine.high %v296_v29, %v300_v30  ;;  %v3298_v37 = vcombine.high %v297_v32, %v301_v33  ;;  %v353_v29 = vld [vmem:[%s4748_s1 + $0xa48] sm:$0xff]  ;;  %v3345_v33 = vcombine.low %v345_v19, %v349_v20 }
  0x6f   :  { %2454 = vmatprep.subr.bf16.mxu0 %v3240_v38  ;;  %2577 = vmatprep.subr.bf16.mxu1 %v3242_v39  ;;  %v304_v38 = vld [vmem:[%s4748_s1 + $0x8c0] sm:$0xff]  ;;  %v357_v30 = vld [vmem:[%s4748_s1 + $0xa68] sm:$0xff] }
  0x70   :  { %v308_v39 = vld [vmem:[%s4748_s1 + $0x8e0] sm:$0xff] }
  0x71   :  { %v3303_v50 = vcombine.low %v304_v38, %v308_v39 }
  0x72   :  { %2455 = vmatpush1.bf16.msra.mxu0 %v3239_v44  ;;  %2578 = vmatpush1.bf16.msra.mxu1 %v3241_v45  ;;  %v3304_v44 = vcombine.high %v304_v38, %v308_v39  ;;  %v3306_v45 = vcombine.high %v305_v40, %v309_v41  ;;  %v361_v38 = vld [vmem:[%s4748_s1 + $0xa88] sm:$0xff]  ;;  %v3353_v41 = vcombine.low %v353_v29, %v357_v30 }
  0x73   :  { %2456 = vmatprep.subr.bf16.mxu0 %v3248_v46  ;;  %2579 = vmatprep.subr.bf16.mxu1 %v3250_v47  ;;  %v312_v46 = vld [vmem:[%s4748_s1 + $0x900] sm:$0xff]  ;;  %v365_v39 = vld [vmem:[%s4748_s1 + $0xaa8] sm:$0xff] }
  0x74   :  { %v316_v47 = vld [vmem:[%s4748_s1 + $0x920] sm:$0xff] }
  0x75   :  { %v3311_v60 = vcombine.low %v312_v46, %v316_v47 }
  0x76   :  { %2457 = vmatpush1.bf16.msra.mxu0 %v3247_v52  ;;  %2580 = vmatpush1.bf16.msra.mxu1 %v3249_v54  ;;  %v3312_v52 = vcombine.high %v312_v46, %v316_v47  ;;  %v3314_v54 = vcombine.high %v313_v48, %v317_v49  ;;  %v369_v46 = vld [vmem:[%s4748_s1 + $0xac8] sm:$0xff]  ;;  %v3361_v49 = vcombine.low %v361_v38, %v365_v39 }
  0x77   :  { %2458 = vmatprep.subr.bf16.mxu0 %v3256_v55  ;;  %2581 = vmatprep.subr.bf16.mxu1 %v3258_v56  ;;  %v320_v55 = vld [vmem:[%s4748_s1 + $0x940] sm:$0xff]  ;;  %v373_v47 = vld [vmem:[%s4748_s1 + $0xae8] sm:$0xff] }
  0x78   :  { %v324_v56 = vld [vmem:[%s4748_s1 + $0x960] sm:$0xff] }
  0x79   :  { %v3319_v4 = vcombine.low %v320_v55, %v324_v56 }
  0x7a   :  { %2459 = vmatpush1.bf16.msra.mxu0 %v3255_v62  ;;  %2582 = vmatpush1.bf16.msra.mxu1 %v3257_v63  ;;  %v3320_v62 = vcombine.high %v320_v55, %v324_v56  ;;  %v3322_v63 = vcombine.high %v321_v58, %v325_v59  ;;  %v377_v55 = vld [vmem:[%s4748_s1 + $0xb08] sm:$0xff]  ;;  %v3369_v59 = vcombine.low %v369_v46, %v373_v47 }
  0x7b   :  { %2460 = vmatprep.subr.bf16.mxu0 %v3264_v0  ;;  %2583 = vmatprep.subr.bf16.mxu1 %v3266_v1  ;;  %v328_v0 = vld [vmem:[%s4748_s1 + $0x980] sm:$0xff]  ;;  %v381_v56 = vld [vmem:[%s4748_s1 + $0xb28] sm:$0xff] }
  0x7c   :  { %v332_v1 = vld [vmem:[%s4748_s1 + $0x9a0] sm:$0xff] }
  0x7d   :  { %v3327_v13 = vcombine.low %v328_v0, %v332_v1 }
  0x7e   :  { %2461 = vmatpush1.bf16.msra.mxu0 %v3263_v6  ;;  %2584 = vmatpush1.bf16.msra.mxu1 %v3265_v7  ;;  %v3328_v6 = vcombine.high %v328_v0, %v332_v1  ;;  %v3330_v7 = vcombine.high %v329_v2, %v333_v3  ;;  %v385_v0 = vld [vmem:[%s4748_s1 + $0xb48] sm:$0xff]  ;;  %v3377_v3 = vcombine.low %v377_v55, %v381_v56 }
  0x7f   :  { %2462 = vmatprep.subr.bf16.mxu0 %v3272_v8  ;;  %2585 = vmatprep.subr.bf16.mxu1 %v3274_v9  ;;  %v336_v8 = vld [vmem:[%s4748_s1 + $0x9c0] sm:$0xff]  ;;  %v389_v1 = vld [vmem:[%s4748_s1 + $0xb68] sm:$0xff] }
  0x80   :  { %v340_v9 = vld [vmem:[%s4748_s1 + $0x9e0] sm:$0xff] }
  0x81   :  { %v3335_v23 = vcombine.low %v336_v8, %v340_v9 }
  0x82   :  { %2463 = vmatpush1.bf16.msra.mxu0 %v3271_v16  ;;  %2586 = vmatpush1.bf16.msra.mxu1 %v3273_v17  ;;  %v3336_v16 = vcombine.high %v336_v8, %v340_v9  ;;  %v3338_v17 = vcombine.high %v337_v10, %v341_v11  ;;  %v393_v8 = vld [vmem:[%s4748_s1 + $0xb88] sm:$0xff]  ;;  %v3385_v11 = vcombine.low %v385_v0, %v389_v1 }
  0x83   :  { %2473 = vmatprep.subr.bf16.mxu0 %v3280_v53  ;;  %2596 = vmatprep.subr.bf16.mxu1 %v3282_v18  ;;  %v344_v53 = vld [vmem:[%s4748_s1 + $0xa00] sm:$0xff]  ;;  %v397_v9 = vld [vmem:[%s4748_s1 + $0xba8] sm:$0xff] }
  0x84   :  { %v348_v18 = vld [vmem:[%s4748_s1 + $0xa20] sm:$0xff] }
  0x85   :  { %2465 = vmatmul.mubr.bf16.vlgmr.msra.gmra.mrb[0].mxu0 %v3920_v22  ;;  %2588 = vmatmul.mubr.bf16.vlgmr.msra.gmra.mrb[0].mxu1 %v3920_v22  ;;  %v3343_v32 = vcombine.low %v344_v53, %v348_v18 }
  0x86   :  { %2474 = vmatpush1.bf16.msra.mxu0 %v3279_v26  ;;  %2597 = vmatpush1.bf16.msra.mxu1 %v3281_v27  ;;  %v3344_v26 = vcombine.high %v344_v53, %v348_v18  ;;  %v3346_v27 = vcombine.high %v345_v19, %v349_v20  ;;  %v401_v53 = vld [vmem:[%s4748_s1 + $0xbc8] sm:$0xff]  ;;  %v3393_v20 = vcombine.low %v393_v8, %v397_v9 }
  0x87   :  { %2475 = vmatprep.subr.bf16.mxu0 %v3288_v15  ;;  %2598 = vmatprep.subr.bf16.mxu1 %v3290_v28  ;;  %v352_v15 = vld [vmem:[%s4748_s1 + $0xa40] sm:$0xff]  ;;  %v405_v18 = vld [vmem:[%s4748_s1 + $0xbe8] sm:$0xff] }
  0x88   :  { %2505 = vmatprep.mubr.bf16.mxu0 %v3941_v31  ;;  %2628 = vmatprep.mubr.bf16.mxu1 %v3941_v31  ;;  %v356_v28 = vld [vmem:[%s4748_s1 + $0xa60] sm:$0xff] }
  0x89   :  { %v3351_v40 = vcombine.low %v352_v15, %v356_v28 }
  0x8a   :  { %2476 = vmatpush1.bf16.msra.mxu0 %v3287_v34  ;;  %2599 = vmatpush1.bf16.msra.mxu1 %v3289_v35  ;;  %v3352_v34 = vcombine.high %v352_v15, %v356_v28  ;;  %v3354_v35 = vcombine.high %v353_v29, %v357_v30  ;;  %v27_v15 = vld [vmem:[%s4748_s1 + $0x18] sm:$0xff]  ;;  %v3401_v30 = vcombine.low %v401_v53, %v405_v18 }
  0x8b   :  { %2477 = vmatprep.subr.bf16.mxu0 %v3296_v36  ;;  %2600 = vmatprep.subr.bf16.mxu1 %v3298_v37  ;;  %v360_v36 = vld [vmem:[%s4748_s1 + $0xa80] sm:$0xff]  ;;  %v31_v28 = vld [vmem:[%s4748_s1 + $0x38] sm:$0xff] }
  0x8c   :  { %v364_v37 = vld [vmem:[%s4748_s1 + $0xaa0] sm:$0xff] }
  0x8d   :  { %v3359_v48 = vcombine.low %v360_v36, %v364_v37 }
  0x8e   :  { %2478 = vmatpush1.bf16.msra.mxu0 %v3295_v42  ;;  %2601 = vmatpush1.bf16.msra.mxu1 %v3297_v43  ;;  %v3360_v42 = vcombine.high %v360_v36, %v364_v37  ;;  %v3362_v43 = vcombine.high %v361_v38, %v365_v39  ;;  %v4129_v36 = vcombine.low %v3931_v25, %v3931_v25  ;;  %v35_v37 = vld [vmem:[%s4748_s1 + $0x58] sm:$0xff]  ;;  %v42_v25 = vld [vmem:[%s4748_s1 + $0x90] sm:$0xff] }
  0x8f   :  { %2479 = vmatprep.subr.bf16.mxu0 %v3304_v44  ;;  %2602 = vmatprep.subr.bf16.mxu1 %v3306_v45  ;;  %v368_v44 = vld [vmem:[%s4748_s1 + $0xac0] sm:$0xff]  ;;  %v39_v38 = vld [vmem:[%s4748_s1 + $0x78] sm:$0xff] }
  0x90   :  { %v372_v45 = vld [vmem:[%s4748_s1 + $0xae0] sm:$0xff] }
  0x91   :  { %v3367_v58 = vcombine.low %v368_v44, %v372_v45 }
  0x92   :  { %2480 = vmatpush1.bf16.msra.mxu0 %v3303_v50  ;;  %2603 = vmatpush1.bf16.msra.mxu1 %v3305_v51  ;;  %v3368_v50 = vcombine.high %v368_v44, %v372_v45  ;;  %v3370_v51 = vcombine.high %v369_v46, %v373_v47  ;;  %v43_v44 = vld [vmem:[%s4748_s1 + $0x98] sm:$0xff]  ;;  %v3037_v47 = vcombine.low %v35_v37, %v39_v38 }
  0x93   :  { %2481 = vmatprep.subr.bf16.mxu0 %v3312_v52  ;;  %2604 = vmatprep.subr.bf16.mxu1 %v3314_v54  ;;  %v376_v52 = vld [vmem:[%s4748_s1 + $0xb00] sm:$0xff]  ;;  %v47_v45 = vld [vmem:[%s4748_s1 + $0xb8] sm:$0xff] }
  0x94   :  { %v380_v54 = vld [vmem:[%s4748_s1 + $0xb20] sm:$0xff] }
  0x95   :  { %v3375_v2 = vcombine.low %v376_v52, %v380_v54 }
  0x96   :  { %2482 = vmatpush1.bf16.msra.mxu0 %v3311_v60  ;;  %2605 = vmatpush1.bf16.msra.mxu1 %v3313_v61  ;;  %v3376_v60 = vcombine.high %v376_v52, %v380_v54  ;;  %v3378_v61 = vcombine.high %v377_v55, %v381_v56  ;;  %v51_v52 = vld [vmem:[%s4748_s1 + $0xd8] sm:$0xff]  ;;  %v3045_v56 = vcombine.low %v43_v44, %v47_v45 }
  0x97   :  { %2483 = vmatprep.subr.bf16.mxu0 %v3320_v62  ;;  %2606 = vmatprep.subr.bf16.mxu1 %v3322_v63  ;;  %v384_v62 = vld [vmem:[%s4748_s1 + $0xb40] sm:$0xff]  ;;  %v55_v54 = vld [vmem:[%s4748_s1 + $0xf8] sm:$0xff] }
  0x98   :  { %v388_v63 = vld [vmem:[%s4748_s1 + $0xb60] sm:$0xff] }
  0x99   :  { %v3383_v10 = vcombine.low %v384_v62, %v388_v63 }
  0x9a   :  { %2484 = vmatpush1.bf16.msra.mxu0 %v3319_v4  ;;  %2607 = vmatpush1.bf16.msra.mxu1 %v3321_v5  ;;  %v3384_v4 = vcombine.high %v384_v62, %v388_v63  ;;  %v3386_v5 = vcombine.high %v385_v0, %v389_v1  ;;  %v63_v62 = vld [vmem:[%s4748_s1 + $0x138] sm:$0xff]  ;;  %v3053_v0 = vcombine.low %v51_v52, %v55_v54 }
  0x9b   :  { %2485 = vmatprep.subr.bf16.mxu0 %v3328_v6  ;;  %2608 = vmatprep.subr.bf16.mxu1 %v3330_v7  ;;  %v392_v6 = vld [vmem:[%s4748_s1 + $0xb80] sm:$0xff] }
  0x9c   :  { %v396_v7 = vld [vmem:[%s4748_s1 + $0xba0] sm:$0xff] }
  0x9d   :  { %v3391_v19 = vcombine.low %v392_v6, %v396_v7 }
  0x9e   :  { %2486 = vmatpush1.bf16.msra.mxu0 %v3327_v13  ;;  %2609 = vmatpush1.bf16.msra.mxu1 %v3329_v14  ;;  %v3392_v13 = vcombine.high %v392_v6, %v396_v7  ;;  %v3394_v14 = vcombine.high %v393_v8, %v397_v9  ;;  %v71_v6 = vld [vmem:[%s4748_s1 + $0x178] sm:$0xff] }
  0x9f   :  { %2487 = vmatprep.subr.bf16.mxu0 %v3336_v16  ;;  %2610 = vmatprep.subr.bf16.mxu1 %v3338_v17  ;;  %v400_v16 = vld [vmem:[%s4748_s1 + $0xbc0] sm:$0xff] }
  0xa0   :  { %v404_v17 = vld [vmem:[%s4748_s1 + $0xbe0] sm:$0xff] }
  0xa1   :  { %v3399_v29 = vcombine.low %v400_v16, %v404_v17 }
  0xa2   :  { %2488 = vmatpush1.bf16.msra.mxu0 %v3335_v23  ;;  %2611 = vmatpush1.bf16.msra.mxu1 %v3337_v24  ;;  %v3400_v23 = vcombine.high %v400_v16, %v404_v17  ;;  %v3402_v24 = vcombine.high %v401_v53, %v405_v18  ;;  %v79_v16 = vld [vmem:[%s4748_s1 + $0x1b8] sm:$0xff] }
  0xa3   :  { %2489 = vmatprep.subr.bf16.mxu0 %v3344_v26  ;;  %2612 = vmatprep.subr.bf16.mxu1 %v3346_v27  ;;  %v26_v26 = vld [vmem:[%s4748_s1 + $0x10] sm:$0xff] }
  0xa4   :  { %v30_v27 = vld [vmem:[%s4748_s1 + $0x30] sm:$0xff] }
  0xa5   :  { %v3027_v39 = vcombine.low %v26_v26, %v30_v27 }
  0xa6   :  { %2490 = vmatpush1.bf16.msra.mxu0 %v3343_v32  ;;  %2613 = vmatpush1.bf16.msra.mxu1 %v3345_v33  ;;  %v3028_v32 = vcombine.high %v26_v26, %v30_v27  ;;  %v3030_v33 = vcombine.high %v27_v15, %v31_v28  ;;  %v87_v26 = vld [vmem:[%s4748_s1 + $0x1f8] sm:$0xff] }
  0xa7   :  { %2491 = vmatprep.subr.bf16.mxu0 %v3352_v34  ;;  %2614 = vmatprep.subr.bf16.mxu1 %v3354_v35  ;;  %v34_v34 = vld [vmem:[%s4748_s1 + $0x50] sm:$0xff] }
  0xa8   :  { %v38_v35 = vld [vmem:[%s4748_s1 + $0x70] sm:$0xff] }
  0xa9   :  { %v3035_v46 = vcombine.low %v34_v34, %v38_v35 }
  0xaa   :  { %2492 = vmatpush1.bf16.msra.mxu0 %v3351_v40  ;;  %2615 = vmatpush1.bf16.msra.mxu1 %v3353_v41  ;;  %v3029_v40 = vcombine.low %v27_v15, %v31_v28  ;;  %v3036_v41 = vcombine.high %v34_v34, %v38_v35  ;;  %v95_v34 = vld [vmem:[%s4748_s1 + $0x238] sm:$0xff] }
  0xab   :  { %2493 = vmatprep.subr.bf16.mxu0 %v3360_v42  ;;  %2616 = vmatprep.subr.bf16.mxu1 %v3362_v43  ;;  %v3038_v42 = vcombine.high %v35_v37, %v39_v38  ;;  %v46_v43 = vld [vmem:[%s4748_s1 + $0xb0] sm:$0xff] }
  0xac   :  { %v3043_v55 = vcombine.low %v42_v25, %v46_v43 }
  0xae   :  { %2494 = vmatpush1.bf16.msra.mxu0 %v3359_v48  ;;  %2617 = vmatpush1.bf16.msra.mxu1 %v3361_v49  ;;  %v3044_v48 = vcombine.high %v42_v25, %v46_v43  ;;  %v3046_v49 = vcombine.high %v43_v44, %v47_v45  ;;  %v103_v25 = vld [vmem:[%s4748_s1 + $0x278] sm:$0xff] }
  0xaf   :  { %2495 = vmatprep.subr.bf16.mxu0 %v3368_v50  ;;  %2618 = vmatprep.subr.bf16.mxu1 %v3370_v51  ;;  %v50_v50 = vld [vmem:[%s4748_s1 + $0xd0] sm:$0xff] }
  0xb0   :  { %v54_v51 = vld [vmem:[%s4748_s1 + $0xf0] sm:$0xff] }
  0xb1   :  { %v3051_v63 = vcombine.low %v50_v50, %v54_v51 }
  0xb2   :  { %2496 = vmatpush1.bf16.msra.mxu0 %v3367_v58  ;;  %2619 = vmatpush1.bf16.msra.mxu1 %v3369_v59  ;;  %v3052_v58 = vcombine.high %v50_v50, %v54_v51  ;;  %v3054_v59 = vcombine.high %v51_v52, %v55_v54  ;;  %v111_v50 = vld [vmem:[%s4748_s1 + $0x2b8] sm:$0xff] }
  0xb3   :  { %2497 = vmatprep.subr.bf16.mxu0 %v3376_v60  ;;  %2620 = vmatprep.subr.bf16.mxu1 %v3378_v61  ;;  %v58_v60 = vld [vmem:[%s4748_s1 + $0x110] sm:$0xff] }
  0xb4   :  { %v62_v61 = vld [vmem:[%s4748_s1 + $0x130] sm:$0xff] }
  0xb5   :  { %v3060_v1 = vcombine.high %v58_v60, %v62_v61  ;;  %v3059_v7 = vcombine.low %v58_v60, %v62_v61  ;;  %v119_v60 = vld [vmem:[%s4748_s1 + $0x2f8] sm:$0xff] }
  0xb6   :  { %2498 = vmatpush1.bf16.msra.mxu0 %v3375_v2  ;;  %2621 = vmatpush1.bf16.msra.mxu1 %v3377_v3  ;;  %v66_v3 = vld [vmem:[%s4748_s1 + $0x150] sm:$0xff] }
  0xb7   :  { %2499 = vmatprep.subr.bf16.mxu0 %v3384_v4  ;;  %2622 = vmatprep.subr.bf16.mxu1 %v3386_v5  ;;  %v70_v4 = vld [vmem:[%s4748_s1 + $0x170] sm:$0xff]  ;;  %v67_v5 = vld [vmem:[%s4748_s1 + $0x158] sm:$0xff] }
  0xb8   :  { %v3068_v9 = vcombine.high %v66_v3, %v70_v4  ;;  %v3067_v17 = vcombine.low %v66_v3, %v70_v4  ;;  %v3069_v53 = vcombine.low %v67_v5, %v71_v6  ;;  %v127_v3 = vld [vmem:[%s4748_s1 + $0x338] sm:$0xff] }
  0xba   :  { %2500 = vmatpush1.bf16.msra.mxu0 %v3383_v10  ;;  %2623 = vmatpush1.bf16.msra.mxu1 %v3385_v11  ;;  %v3070_v10 = vcombine.high %v67_v5, %v71_v6  ;;  %v74_v11 = vld [vmem:[%s4748_s1 + $0x190] sm:$0xff] }
  0xbb   :  { %2501 = vmatprep.subr.bf16.mxu0 %v3392_v13  ;;  %2624 = vmatprep.subr.bf16.mxu1 %v3394_v14  ;;  %v78_v13 = vld [vmem:[%s4748_s1 + $0x1b0] sm:$0xff]  ;;  %v75_v14 = vld [vmem:[%s4748_s1 + $0x198] sm:$0xff] }
  0xbc   :  { %v3076_v18 = vcombine.high %v74_v11, %v78_v13  ;;  %v3075_v27 = vcombine.low %v74_v11, %v78_v13  ;;  %v3077_v15 = vcombine.low %v75_v14, %v79_v16  ;;  %v135_v11 = vld [vmem:[%s4748_s1 + $0x378] sm:$0xff] }
  0xbe   :  { %2502 = vmatpush1.bf16.msra.mxu0 %v3391_v19  ;;  %2625 = vmatpush1.bf16.msra.mxu1 %v3393_v20  ;;  %v3078_v19 = vcombine.high %v75_v14, %v79_v16  ;;  %v82_v20 = vld [vmem:[%s4748_s1 + $0x1d0] sm:$0xff] }
  0xbf   :  { %2503 = vmatprep.subr.bf16.mxu0 %v3400_v23  ;;  %2626 = vmatprep.subr.bf16.mxu1 %v3402_v24  ;;  %v86_v23 = vld [vmem:[%s4748_s1 + $0x1f0] sm:$0xff]  ;;  %v83_v24 = vld [vmem:[%s4748_s1 + $0x1d8] sm:$0xff] }
  0xc0   :  { %v3084_v28 = vcombine.high %v82_v20, %v86_v23  ;;  %v3083_v35 = vcombine.low %v82_v20, %v86_v23  ;;  %v3085_v37 = vcombine.low %v83_v24, %v87_v26  ;;  %v143_v20 = vld [vmem:[%s4748_s1 + $0x3b8] sm:$0xff] }
  0xc2   :  { %2504 = vmatpush1.bf16.msra.mxu0 %v3399_v29  ;;  %2627 = vmatpush1.bf16.msra.mxu1 %v3401_v30  ;;  %v3086_v29 = vcombine.high %v83_v24, %v87_v26  ;;  %v90_v30 = vld [vmem:[%s4748_s1 + $0x210] sm:$0xff] }
  0xc3   :  { %2637 = vmatprep.subr.bf16.mxu0 %v3028_v32  ;;  %2760 = vmatprep.subr.bf16.mxu1 %v3030_v33  ;;  %v94_v32 = vld [vmem:[%s4748_s1 + $0x230] sm:$0xff]  ;;  %v91_v33 = vld [vmem:[%s4748_s1 + $0x218] sm:$0xff] }
  0xc4   :  { %v3092_v38 = vcombine.high %v90_v30, %v94_v32  ;;  %v3091_v43 = vcombine.low %v90_v30, %v94_v32  ;;  %v3093_v44 = vcombine.low %v91_v33, %v95_v34  ;;  %v151_v30 = vld [vmem:[%s4748_s1 + $0x3f8] sm:$0xff] }
  0xc5   :  { %2506 = vmatmul.mubr.bf16.vlgmr.msra.gmra.mrb[0].mxu0 %v4129_v36  ;;  %2629 = vmatmul.mubr.bf16.vlgmr.msra.gmra.mrb[0].mxu1 %v4129_v36 }
  0xc6   :  { %2638 = vmatpush1.bf16.msra.mxu0 %v3027_v39  ;;  %2761 = vmatpush1.bf16.msra.mxu1 %v3029_v40  ;;  %v3094_v39 = vcombine.high %v91_v33, %v95_v34  ;;  %v98_v40 = vld [vmem:[%s4748_s1 + $0x250] sm:$0xff] }
  0xc7   :  { %2639 = vmatprep.subr.bf16.mxu0 %v3036_v41  ;;  %2762 = vmatprep.subr.bf16.mxu1 %v3038_v42  ;;  %v102_v41 = vld [vmem:[%s4748_s1 + $0x270] sm:$0xff]  ;;  %v99_v42 = vld [vmem:[%s4748_s1 + $0x258] sm:$0xff] }
  0xc8   :  { %2669 = vmatprep.mubr.bf16.mxu0 %v3585_v57  ;;  %2792 = vmatprep.mubr.bf16.mxu1 %v3585_v57  ;;  %v59_v57 = vld [vmem:[%s4748_s1 + $0x118] sm:$0xff]  ;;  %v3100_v45 = vcombine.high %v98_v40, %v102_v41  ;;  %v3099_v51 = vcombine.low %v98_v40, %v102_v41  ;;  %v3101_v52 = vcombine.low %v99_v42, %v103_v25 }
  0xc9   :  { %v3062_v2 = vcombine.high %v59_v57, %v63_v62  ;;  %v3061_v8 = vcombine.low %v59_v57, %v63_v62  ;;  %v159_v40 = vld [vmem:[%s4748_s1 + $0x438] sm:$0xff] }
  0xca   :  { %2640 = vmatpush1.bf16.msra.mxu0 %v3035_v46  ;;  %2763 = vmatpush1.bf16.msra.mxu1 %v3037_v47  ;;  %v3102_v46 = vcombine.high %v99_v42, %v103_v25  ;;  %v106_v47 = vld [vmem:[%s4748_s1 + $0x290] sm:$0xff] }
  0xcb   :  { %2641 = vmatprep.subr.bf16.mxu0 %v3044_v48  ;;  %2764 = vmatprep.subr.bf16.mxu1 %v3046_v49  ;;  %v110_v48 = vld [vmem:[%s4748_s1 + $0x2b0] sm:$0xff]  ;;  %v107_v49 = vld [vmem:[%s4748_s1 + $0x298] sm:$0xff] }
  0xcc   :  { %v3108_v54 = vcombine.high %v106_v47, %v110_v48  ;;  %v3107_v61 = vcombine.low %v106_v47, %v110_v48  ;;  %v3109_v57 = vcombine.low %v107_v49, %v111_v50  ;;  %v167_v47 = vld [vmem:[%s4748_s1 + $0x478] sm:$0xff] }
  0xce   :  { %2642 = vmatpush1.bf16.msra.mxu0 %v3043_v55  ;;  %2765 = vmatpush1.bf16.msra.mxu1 %v3045_v56  ;;  %v3110_v55 = vcombine.high %v107_v49, %v111_v50  ;;  %v114_v56 = vld [vmem:[%s4748_s1 + $0x2d0] sm:$0xff] }
  0xcf   :  { %2643 = vmatprep.subr.bf16.mxu0 %v3052_v58  ;;  %2766 = vmatprep.subr.bf16.mxu1 %v3054_v59  ;;  %v118_v58 = vld [vmem:[%s4748_s1 + $0x2f0] sm:$0xff]  ;;  %v115_v59 = vld [vmem:[%s4748_s1 + $0x2d8] sm:$0xff] }
  0xd0   :  { %v3116_v62 = vcombine.high %v114_v56, %v118_v58  ;;  %v3115_v4 = vcombine.low %v114_v56, %v118_v58  ;;  %v3117_v5 = vcombine.low %v115_v59, %v119_v60  ;;  %v175_v56 = vld [vmem:[%s4748_s1 + $0x4b8] sm:$0xff] }
  0xd2   :  { %2644 = vmatpush1.bf16.msra.mxu0 %v3051_v63  ;;  %2767 = vmatpush1.bf16.msra.mxu1 %v3053_v0  ;;  %v3118_v63 = vcombine.high %v115_v59, %v119_v60  ;;  %v122_v0 = vld [vmem:[%s4748_s1 + $0x310] sm:$0xff] }
  0xd3   :  { %2645 = vmatprep.subr.bf16.mxu0 %v3060_v1  ;;  %2768 = vmatprep.subr.bf16.mxu1 %v3062_v2  ;;  %v126_v1 = vld [vmem:[%s4748_s1 + $0x330] sm:$0xff]  ;;  %v123_v2 = vld [vmem:[%s4748_s1 + $0x318] sm:$0xff] }
  0xd4   :  { %v3124_v6 = vcombine.high %v122_v0, %v126_v1  ;;  %v3123_v13 = vcombine.low %v122_v0, %v126_v1  ;;  %v3125_v14 = vcombine.low %v123_v2, %v127_v3 }
  0xd6   :  { %2646 = vmatpush1.bf16.msra.mxu0 %v3059_v7  ;;  %2769 = vmatpush1.bf16.msra.mxu1 %v3061_v8  ;;  %v3126_v7 = vcombine.high %v123_v2, %v127_v3  ;;  %v130_v8 = vld [vmem:[%s4748_s1 + $0x350] sm:$0xff] }
  0xd7   :  { %2647 = vmatprep.subr.bf16.mxu0 %v3068_v9  ;;  %2770 = vmatprep.subr.bf16.mxu1 %v3070_v10  ;;  %v134_v9 = vld [vmem:[%s4748_s1 + $0x370] sm:$0xff]  ;;  %v131_v10 = vld [vmem:[%s4748_s1 + $0x358] sm:$0xff] }
  0xd8   :  { %v3132_v16 = vcombine.high %v130_v8, %v134_v9  ;;  %v3131_v23 = vcombine.low %v130_v8, %v134_v9  ;;  %v3133_v24 = vcombine.low %v131_v10, %v135_v11 }
  0xda   :  { %2648 = vmatpush1.bf16.msra.mxu0 %v3067_v17  ;;  %2771 = vmatpush1.bf16.msra.mxu1 %v3069_v53  ;;  %v3134_v17 = vcombine.high %v131_v10, %v135_v11  ;;  %v138_v53 = vld [vmem:[%s4748_s1 + $0x390] sm:$0xff] }
  0xdb   :  { %2649 = vmatprep.subr.bf16.mxu0 %v3076_v18  ;;  %2772 = vmatprep.subr.bf16.mxu1 %v3078_v19  ;;  %v142_v18 = vld [vmem:[%s4748_s1 + $0x3b0] sm:$0xff]  ;;  %v139_v19 = vld [vmem:[%s4748_s1 + $0x398] sm:$0xff] }
  0xdc   :  { %v3140_v26 = vcombine.high %v138_v53, %v142_v18  ;;  %v3139_v32 = vcombine.low %v138_v53, %v142_v18  ;;  %v3141_v33 = vcombine.low %v139_v19, %v143_v20  ;;  %v194_v11 = vld [vmem:[%s4748_s1 + $0x550] sm:$0xff] }
  0xde   :  { %2650 = vmatpush1.bf16.msra.mxu0 %v3075_v27  ;;  %2773 = vmatpush1.bf16.msra.mxu1 %v3077_v15  ;;  %v3142_v27 = vcombine.high %v139_v19, %v143_v20  ;;  %v146_v15 = vld [vmem:[%s4748_s1 + $0x3d0] sm:$0xff] }
  0xdf   :  { %2651 = vmatprep.subr.bf16.mxu0 %v3084_v28  ;;  %2774 = vmatprep.subr.bf16.mxu1 %v3086_v29  ;;  %v150_v28 = vld [vmem:[%s4748_s1 + $0x3f0] sm:$0xff]  ;;  %v147_v29 = vld [vmem:[%s4748_s1 + $0x3d8] sm:$0xff] }
  0xe0   :  { %v3148_v34 = vcombine.high %v146_v15, %v150_v28  ;;  %v3147_v41 = vcombine.low %v146_v15, %v150_v28  ;;  %v3149_v42 = vcombine.low %v147_v29, %v151_v30  ;;  %v202_v20 = vld [vmem:[%s4748_s1 + $0x590] sm:$0xff] }
  0xe2   :  { %2652 = vmatpush1.bf16.msra.mxu0 %v3083_v35  ;;  %2775 = vmatpush1.bf16.msra.mxu1 %v3085_v37  ;;  %v3150_v35 = vcombine.high %v147_v29, %v151_v30  ;;  %v154_v37 = vld [vmem:[%s4748_s1 + $0x410] sm:$0xff] }
  0xe3   :  { %2653 = vmatprep.subr.bf16.mxu0 %v3092_v38  ;;  %2776 = vmatprep.subr.bf16.mxu1 %v3094_v39  ;;  %v158_v38 = vld [vmem:[%s4748_s1 + $0x430] sm:$0xff]  ;;  %v155_v39 = vld [vmem:[%s4748_s1 + $0x418] sm:$0xff] }
  0xe4   :  { %v3156_v25 = vcombine.high %v154_v37, %v158_v38  ;;  %v3155_v48 = vcombine.low %v154_v37, %v158_v38  ;;  %v3157_v49 = vcombine.low %v155_v39, %v159_v40  ;;  %v210_v30 = vld [vmem:[%s4748_s1 + $0x5d0] sm:$0xff] }
  0xe6   :  { %2654 = vmatpush1.bf16.msra.mxu0 %v3091_v43  ;;  %2777 = vmatpush1.bf16.msra.mxu1 %v3093_v44  ;;  %v3158_v43 = vcombine.high %v155_v39, %v159_v40  ;;  %v162_v44 = vld [vmem:[%s4748_s1 + $0x450] sm:$0xff] }
  0xe7   :  { %2655 = vmatprep.subr.bf16.mxu0 %v3100_v45  ;;  %2778 = vmatprep.subr.bf16.mxu1 %v3102_v46  ;;  %v166_v45 = vld [vmem:[%s4748_s1 + $0x470] sm:$0xff]  ;;  %v163_v46 = vld [vmem:[%s4748_s1 + $0x458] sm:$0xff] }
  0xe8   :  { %v3164_v50 = vcombine.high %v162_v44, %v166_v45  ;;  %v3163_v58 = vcombine.low %v162_v44, %v166_v45  ;;  %v3165_v59 = vcombine.low %v163_v46, %v167_v47  ;;  %v218_v40 = vld [vmem:[%s4748_s1 + $0x610] sm:$0xff] }
  0xea   :  { %2656 = vmatpush1.bf16.msra.mxu0 %v3099_v51  ;;  %2779 = vmatpush1.bf16.msra.mxu1 %v3101_v52  ;;  %v3166_v51 = vcombine.high %v163_v46, %v167_v47  ;;  %v170_v52 = vld [vmem:[%s4748_s1 + $0x490] sm:$0xff] }
  0xeb   :  { %2657 = vmatprep.subr.bf16.mxu0 %v3108_v54  ;;  %2780 = vmatprep.subr.bf16.mxu1 %v3110_v55  ;;  %v174_v54 = vld [vmem:[%s4748_s1 + $0x4b0] sm:$0xff]  ;;  %v171_v55 = vld [vmem:[%s4748_s1 + $0x498] sm:$0xff] }
  0xec   :  { %v3172_v60 = vcombine.high %v170_v52, %v174_v54  ;;  %v3171_v0 = vcombine.low %v170_v52, %v174_v54  ;;  %v3173_v1 = vcombine.low %v171_v55, %v175_v56  ;;  %v226_v47 = vld [vmem:[%s4748_s1 + $0x650] sm:$0xff] }
  0xee   :  { %2658 = vmatpush1.bf16.msra.mxu0 %v3107_v61  ;;  %2781 = vmatpush1.bf16.msra.mxu1 %v3109_v57  ;;  %v3174_v61 = vcombine.high %v171_v55, %v175_v56  ;;  %v178_v57 = vld [vmem:[%s4748_s1 + $0x4d0] sm:$0xff] }
  0xef   :  { %2659 = vmatprep.subr.bf16.mxu0 %v3116_v62  ;;  %2782 = vmatprep.subr.bf16.mxu1 %v3118_v63  ;;  %v182_v62 = vld [vmem:[%s4748_s1 + $0x4f0] sm:$0xff]  ;;  %v183_v63 = vld [vmem:[%s4748_s1 + $0x4f8] sm:$0xff] }
  0xf0   :  { %v3180_v2 = vcombine.high %v178_v57, %v182_v62  ;;  %v234_v56 = vld [vmem:[%s4748_s1 + $0x690] sm:$0xff] }
  0xf2   :  { %2660 = vmatpush1.bf16.msra.mxu0 %v3115_v4  ;;  %2783 = vmatpush1.bf16.msra.mxu1 %v3117_v5  ;;  %v186_v4 = vld [vmem:[%s4748_s1 + $0x510] sm:$0xff] }
  0xf3   :  { %2661 = vmatprep.subr.bf16.mxu0 %v3124_v6  ;;  %2784 = vmatprep.subr.bf16.mxu1 %v3126_v7  ;;  %v190_v5 = vld [vmem:[%s4748_s1 + $0x530] sm:$0xff]  ;;  %v191_v6 = vld [vmem:[%s4748_s1 + $0x538] sm:$0xff]  ;;  %v3179_v7 = vcombine.low %v178_v57, %v182_v62 }
  0xf4   :  { %v3188_v9 = vcombine.high %v186_v4, %v190_v5 }
  0xf6   :  { %2662 = vmatpush1.bf16.msra.mxu0 %v3123_v13  ;;  %2785 = vmatpush1.bf16.msra.mxu1 %v3125_v14  ;;  %v198_v13 = vld [vmem:[%s4748_s1 + $0x570] sm:$0xff]  ;;  %v195_v14 = vld [vmem:[%s4748_s1 + $0x558] sm:$0xff] }
  0xf7   :  { %2663 = vmatprep.subr.bf16.mxu0 %v3132_v16  ;;  %2786 = vmatprep.subr.bf16.mxu1 %v3134_v17  ;;  %v199_v16 = vld [vmem:[%s4748_s1 + $0x578] sm:$0xff]  ;;  %v3187_v17 = vcombine.low %v186_v4, %v190_v5  ;;  %v3196_v18 = vcombine.high %v194_v11, %v198_v13 }
  0xf8   :  { %v3198_v19 = vcombine.high %v195_v14, %v199_v16  ;;  %v3197_v15 = vcombine.low %v195_v14, %v199_v16  ;;  %v258_v16 = vld [vmem:[%s4748_s1 + $0x750] sm:$0xff] }
  0xfa   :  { %2664 = vmatpush1.bf16.msra.mxu0 %v3131_v23  ;;  %2787 = vmatpush1.bf16.msra.mxu1 %v3133_v24  ;;  %v206_v23 = vld [vmem:[%s4748_s1 + $0x5b0] sm:$0xff]  ;;  %v203_v24 = vld [vmem:[%s4748_s1 + $0x598] sm:$0xff] }
  0xfb   :  { %2665 = vmatprep.subr.bf16.mxu0 %v3140_v26  ;;  %2788 = vmatprep.subr.bf16.mxu1 %v3142_v27  ;;  %v207_v26 = vld [vmem:[%s4748_s1 + $0x5b8] sm:$0xff]  ;;  %v3195_v27 = vcombine.low %v194_v11, %v198_v13  ;;  %v3204_v28 = vcombine.high %v202_v20, %v206_v23 }
  0xfc   :  { %v3206_v29 = vcombine.high %v203_v24, %v207_v26  ;;  %v3205_v37 = vcombine.low %v203_v24, %v207_v26  ;;  %v266_v26 = vld [vmem:[%s4748_s1 + $0x790] sm:$0xff] }
  0xfe   :  { %2666 = vmatpush1.bf16.msra.mxu0 %v3139_v32  ;;  %2789 = vmatpush1.bf16.msra.mxu1 %v3141_v33  ;;  %v214_v32 = vld [vmem:[%s4748_s1 + $0x5f0] sm:$0xff]  ;;  %v211_v33 = vld [vmem:[%s4748_s1 + $0x5d8] sm:$0xff] }
  0xff   :  { %2667 = vmatprep.subr.bf16.mxu0 %v3148_v34  ;;  %2790 = vmatprep.subr.bf16.mxu1 %v3150_v35  ;;  %v215_v34 = vld [vmem:[%s4748_s1 + $0x5f8] sm:$0xff]  ;;  %v3203_v35 = vcombine.low %v202_v20, %v206_v23  ;;  %v3212_v38 = vcombine.high %v210_v30, %v214_v32 }
 0x100   :  { %v3214_v39 = vcombine.high %v211_v33, %v215_v34  ;;  %v3213_v44 = vcombine.low %v211_v33, %v215_v34  ;;  %v274_v34 = vld [vmem:[%s4748_s1 + $0x7d0] sm:$0xff] }
 0x102   :  { %2668 = vmatpush1.bf16.msra.mxu0 %v3147_v41  ;;  %2791 = vmatpush1.bf16.msra.mxu1 %v3149_v42  ;;  %v222_v41 = vld [vmem:[%s4748_s1 + $0x630] sm:$0xff]  ;;  %v219_v42 = vld [vmem:[%s4748_s1 + $0x618] sm:$0xff] }
 0x103   :  { %2678 = vmatprep.subr.bf16.mxu0 %v3156_v25  ;;  %2801 = vmatprep.subr.bf16.mxu1 %v3158_v43  ;;  %v223_v25 = vld [vmem:[%s4748_s1 + $0x638] sm:$0xff]  ;;  %v3211_v43 = vcombine.low %v210_v30, %v214_v32  ;;  %v3220_v45 = vcombine.high %v218_v40, %v222_v41 }
 0x104   :  { %v3222_v46 = vcombine.high %v219_v42, %v223_v25  ;;  %v3221_v52 = vcombine.low %v219_v42, %v223_v25  ;;  %v282_v25 = vld [vmem:[%s4748_s1 + $0x810] sm:$0xff] }
 0x105   :  { %2670 = vmatmul.mubr.bf16.vlgmr.msra.gmra.mrb[4].mxu0 %v3711_v12  ;;  %2793 = vmatmul.mubr.bf16.vlgmr.msra.gmra.mrb[4].mxu1 %v3711_v12  ;;  %v179_v12 = vld [vmem:[%s4748_s1 + $0x4d8] sm:$0xff] }
 0x106   :  { %2679 = vmatpush1.bf16.msra.mxu0 %v3155_v48  ;;  %2802 = vmatpush1.bf16.msra.mxu1 %v3157_v49  ;;  %v3182_v3 = vcombine.high %v179_v12, %v183_v63  ;;  %v3181_v8 = vcombine.low %v179_v12, %v183_v63  ;;  %v230_v48 = vld [vmem:[%s4748_s1 + $0x670] sm:$0xff]  ;;  %v227_v49 = vld [vmem:[%s4748_s1 + $0x658] sm:$0xff] }
 0x107   :  { %2680 = vmatprep.subr.bf16.mxu0 %v3164_v50  ;;  %2803 = vmatprep.subr.bf16.mxu1 %v3166_v51  ;;  %v231_v50 = vld [vmem:[%s4748_s1 + $0x678] sm:$0xff]  ;;  %v3219_v51 = vcombine.low %v218_v40, %v222_v41  ;;  %v3228_v54 = vcombine.high %v226_v47, %v230_v48  ;;  %v242_v63 = vld [vmem:[%s4748_s1 + $0x6d0] sm:$0xff] }
 0x108   :  { %2710 = vmatprep.mubr.bf16.mxu0 %v3732_v21  ;;  %2833 = vmatprep.mubr.bf16.mxu1 %v3732_v21  ;;  %v187_v21 = vld [vmem:[%s4748_s1 + $0x518] sm:$0xff]  ;;  %v3230_v55 = vcombine.high %v227_v49, %v231_v50  ;;  %v3229_v57 = vcombine.low %v227_v49, %v231_v50  ;;  %v290_v50 = vld [vmem:[%s4748_s1 + $0x850] sm:$0xff] }
 0x109   :  { %v3190_v10 = vcombine.high %v187_v21, %v191_v6  ;;  %v3189_v53 = vcombine.low %v187_v21, %v191_v6  ;;  %v250_v6 = vld [vmem:[%s4748_s1 + $0x710] sm:$0xff] }
 0x10a   :  { %2681 = vmatpush1.bf16.msra.mxu0 %v3163_v58  ;;  %2804 = vmatpush1.bf16.msra.mxu1 %v3165_v59  ;;  %v238_v58 = vld [vmem:[%s4748_s1 + $0x6b0] sm:$0xff]  ;;  %v235_v59 = vld [vmem:[%s4748_s1 + $0x698] sm:$0xff] }
 0x10b   :  { %2682 = vmatprep.subr.bf16.mxu0 %v3172_v60  ;;  %2805 = vmatprep.subr.bf16.mxu1 %v3174_v61  ;;  %v239_v60 = vld [vmem:[%s4748_s1 + $0x6b8] sm:$0xff]  ;;  %v3227_v61 = vcombine.low %v226_v47, %v230_v48  ;;  %v3236_v62 = vcombine.high %v234_v56, %v238_v58 }
 0x10c   :  { %v3238_v12 = vcombine.high %v235_v59, %v239_v60  ;;  %v3237_v4 = vcombine.low %v235_v59, %v239_v60  ;;  %v298_v60 = vld [vmem:[%s4748_s1 + $0x890] sm:$0xff] }
 0x10e   :  { %2683 = vmatpush1.bf16.msra.mxu0 %v3171_v0  ;;  %2806 = vmatpush1.bf16.msra.mxu1 %v3173_v1  ;;  %v246_v0 = vld [vmem:[%s4748_s1 + $0x6f0] sm:$0xff]  ;;  %v243_v1 = vld [vmem:[%s4748_s1 + $0x6d8] sm:$0xff] }
 0x10f   :  { %2684 = vmatprep.subr.bf16.mxu0 %v3180_v2  ;;  %2807 = vmatprep.subr.bf16.mxu1 %v3182_v3  ;;  %v247_v2 = vld [vmem:[%s4748_s1 + $0x6f8] sm:$0xff]  ;;  %v3235_v3 = vcombine.low %v234_v56, %v238_v58  ;;  %v3244_v5 = vcombine.high %v242_v63, %v246_v0 }
 0x110   :  { %v3246_v21 = vcombine.high %v243_v1, %v247_v2  ;;  %v3245_v11 = vcombine.low %v243_v1, %v247_v2  ;;  %v306_v2 = vld [vmem:[%s4748_s1 + $0x8d0] sm:$0xff] }
 0x112   :  { %2685 = vmatpush1.bf16.msra.mxu0 %v3179_v7  ;;  %2808 = vmatpush1.bf16.msra.mxu1 %v3181_v8  ;;  %v254_v7 = vld [vmem:[%s4748_s1 + $0x730] sm:$0xff]  ;;  %v251_v8 = vld [vmem:[%s4748_s1 + $0x718] sm:$0xff] }
 0x113   :  { %2686 = vmatprep.subr.bf16.mxu0 %v3188_v9  ;;  %2809 = vmatprep.subr.bf16.mxu1 %v3190_v10  ;;  %v255_v9 = vld [vmem:[%s4748_s1 + $0x738] sm:$0xff]  ;;  %v3243_v10 = vcombine.low %v242_v63, %v246_v0  ;;  %v3252_v13 = vcombine.high %v250_v6, %v254_v7 }
 0x114   :  { %v3254_v14 = vcombine.high %v251_v8, %v255_v9  ;;  %v3253_v20 = vcombine.low %v251_v8, %v255_v9  ;;  %v314_v8 = vld [vmem:[%s4748_s1 + $0x910] sm:$0xff] }
 0x115   :  { %v318_v9 = vld [vmem:[%s4748_s1 + $0x930] sm:$0xff] }
 0x116   :  { %2687 = vmatpush1.bf16.msra.mxu0 %v3187_v17  ;;  %2810 = vmatpush1.bf16.msra.mxu1 %v3189_v53  ;;  %v262_v17 = vld [vmem:[%s4748_s1 + $0x770] sm:$0xff]  ;;  %v259_v53 = vld [vmem:[%s4748_s1 + $0x758] sm:$0xff] }
 0x117   :  { %2688 = vmatprep.subr.bf16.mxu0 %v3196_v18  ;;  %2811 = vmatprep.subr.bf16.mxu1 %v3198_v19  ;;  %v263_v18 = vld [vmem:[%s4748_s1 + $0x778] sm:$0xff]  ;;  %v3251_v19 = vcombine.low %v250_v6, %v254_v7  ;;  %v3260_v23 = vcombine.high %v258_v16, %v262_v17 }
 0x118   :  { %v3262_v24 = vcombine.high %v259_v53, %v263_v18  ;;  %v3261_v30 = vcombine.low %v259_v53, %v263_v18  ;;  %v326_v53 = vld [vmem:[%s4748_s1 + $0x970] sm:$0xff]  ;;  %v323_v18 = vld [vmem:[%s4748_s1 + $0x958] sm:$0xff] }
 0x11a   :  { %2689 = vmatpush1.bf16.msra.mxu0 %v3195_v27  ;;  %2812 = vmatpush1.bf16.msra.mxu1 %v3197_v15  ;;  %v270_v27 = vld [vmem:[%s4748_s1 + $0x7b0] sm:$0xff]  ;;  %v267_v15 = vld [vmem:[%s4748_s1 + $0x798] sm:$0xff] }
 0x11b   :  { %2690 = vmatprep.subr.bf16.mxu0 %v3204_v28  ;;  %2813 = vmatprep.subr.bf16.mxu1 %v3206_v29  ;;  %v271_v28 = vld [vmem:[%s4748_s1 + $0x7b8] sm:$0xff]  ;;  %v3259_v29 = vcombine.low %v258_v16, %v262_v17  ;;  %v3268_v32 = vcombine.high %v266_v26, %v270_v27  ;;  %v322_v17 = vld [vmem:[%s4748_s1 + $0x950] sm:$0xff] }
 0x11c   :  { %v3270_v33 = vcombine.high %v267_v15, %v271_v28  ;;  %v3269_v40 = vcombine.low %v267_v15, %v271_v28  ;;  %v334_v15 = vld [vmem:[%s4748_s1 + $0x9b0] sm:$0xff]  ;;  %v331_v28 = vld [vmem:[%s4748_s1 + $0x998] sm:$0xff] }
 0x11e   :  { %2691 = vmatpush1.bf16.msra.mxu0 %v3203_v35  ;;  %2814 = vmatpush1.bf16.msra.mxu1 %v3205_v37  ;;  %v278_v35 = vld [vmem:[%s4748_s1 + $0x7f0] sm:$0xff]  ;;  %v275_v37 = vld [vmem:[%s4748_s1 + $0x7d8] sm:$0xff] }
 0x11f   :  { %2692 = vmatprep.subr.bf16.mxu0 %v3212_v38  ;;  %2815 = vmatprep.subr.bf16.mxu1 %v3214_v39  ;;  %v279_v38 = vld [vmem:[%s4748_s1 + $0x7f8] sm:$0xff]  ;;  %v3267_v39 = vcombine.low %v266_v26, %v270_v27  ;;  %v3276_v41 = vcombine.high %v274_v34, %v278_v35  ;;  %v330_v27 = vld [vmem:[%s4748_s1 + $0x990] sm:$0xff] }
 0x120   :  { %v3278_v42 = vcombine.high %v275_v37, %v279_v38  ;;  %v3277_v47 = vcombine.low %v275_v37, %v279_v38  ;;  %v342_v37 = vld [vmem:[%s4748_s1 + $0x9f0] sm:$0xff]  ;;  %v339_v38 = vld [vmem:[%s4748_s1 + $0x9d8] sm:$0xff] }
 0x122   :  { %2693 = vmatpush1.bf16.msra.mxu0 %v3211_v43  ;;  %2816 = vmatpush1.bf16.msra.mxu1 %v3213_v44  ;;  %v286_v43 = vld [vmem:[%s4748_s1 + $0x830] sm:$0xff]  ;;  %v283_v44 = vld [vmem:[%s4748_s1 + $0x818] sm:$0xff] }
 0x123   :  { %2694 = vmatprep.subr.bf16.mxu0 %v3220_v45  ;;  %2817 = vmatprep.subr.bf16.mxu1 %v3222_v46  ;;  %v287_v45 = vld [vmem:[%s4748_s1 + $0x838] sm:$0xff]  ;;  %v3275_v46 = vcombine.low %v274_v34, %v278_v35  ;;  %v3284_v48 = vcombine.high %v282_v25, %v286_v43  ;;  %v338_v35 = vld [vmem:[%s4748_s1 + $0x9d0] sm:$0xff] }
 0x124   :  { %v3286_v49 = vcombine.high %v283_v44, %v287_v45  ;;  %v3285_v56 = vcombine.low %v283_v44, %v287_v45  ;;  %v350_v44 = vld [vmem:[%s4748_s1 + $0xa30] sm:$0xff]  ;;  %v347_v45 = vld [vmem:[%s4748_s1 + $0xa18] sm:$0xff] }
 0x126   :  { %2695 = vmatpush1.bf16.msra.mxu0 %v3219_v51  ;;  %2818 = vmatpush1.bf16.msra.mxu1 %v3221_v52  ;;  %v294_v51 = vld [vmem:[%s4748_s1 + $0x870] sm:$0xff]  ;;  %v291_v52 = vld [vmem:[%s4748_s1 + $0x858] sm:$0xff] }
 0x127   :  { %2696 = vmatprep.subr.bf16.mxu0 %v3228_v54  ;;  %2819 = vmatprep.subr.bf16.mxu1 %v3230_v55  ;;  %v295_v54 = vld [vmem:[%s4748_s1 + $0x878] sm:$0xff]  ;;  %v3283_v55 = vcombine.low %v282_v25, %v286_v43  ;;  %v3292_v58 = vcombine.high %v290_v50, %v294_v51  ;;  %v346_v43 = vld [vmem:[%s4748_s1 + $0xa10] sm:$0xff] }
 0x128   :  { %v3294_v59 = vcombine.high %v291_v52, %v295_v54  ;;  %v3293_v63 = vcombine.low %v291_v52, %v295_v54  ;;  %v358_v52 = vld [vmem:[%s4748_s1 + $0xa70] sm:$0xff]  ;;  %v355_v54 = vld [vmem:[%s4748_s1 + $0xa58] sm:$0xff] }
 0x12a   :  { %2697 = vmatpush1.bf16.msra.mxu0 %v3227_v61  ;;  %2820 = vmatpush1.bf16.msra.mxu1 %v3229_v57  ;;  %v302_v61 = vld [vmem:[%s4748_s1 + $0x8b0] sm:$0xff]  ;;  %v299_v57 = vld [vmem:[%s4748_s1 + $0x898] sm:$0xff] }
 0x12b   :  { %2698 = vmatprep.subr.bf16.mxu0 %v3236_v62  ;;  %2821 = vmatprep.subr.bf16.mxu1 %v3238_v12  ;;  %v303_v62 = vld [vmem:[%s4748_s1 + $0x8b8] sm:$0xff]  ;;  %v3291_v12 = vcombine.low %v290_v50, %v294_v51  ;;  %v3300_v0 = vcombine.high %v298_v60, %v302_v61  ;;  %v354_v51 = vld [vmem:[%s4748_s1 + $0xa50] sm:$0xff] }
 0x12c   :  { %v3302_v1 = vcombine.high %v299_v57, %v303_v62 }
 0x12e   :  { %2699 = vmatpush1.bf16.msra.mxu0 %v3235_v3  ;;  %2822 = vmatpush1.bf16.msra.mxu1 %v3237_v4  ;;  %v310_v3 = vld [vmem:[%s4748_s1 + $0x8f0] sm:$0xff]  ;;  %v311_v4 = vld [vmem:[%s4748_s1 + $0x8f8] sm:$0xff] }
 0x12f   :  { %2700 = vmatprep.subr.bf16.mxu0 %v3244_v5  ;;  %2823 = vmatprep.subr.bf16.mxu1 %v3246_v21  ;;  %v3299_v5 = vcombine.low %v298_v60, %v302_v61  ;;  %v3301_v21 = vcombine.low %v299_v57, %v303_v62  ;;  %v3308_v6 = vcombine.high %v306_v2, %v310_v3  ;;  %v362_v61 = vld [vmem:[%s4748_s1 + $0xa90] sm:$0xff]  ;;  %v363_v62 = vld [vmem:[%s4748_s1 + $0xa98] sm:$0xff] }
 0x130   :  { %v366_v57 = vld [vmem:[%s4748_s1 + $0xab0] sm:$0xff] }
 0x132   :  { %2701 = vmatpush1.bf16.msra.mxu0 %v3243_v10  ;;  %2824 = vmatpush1.bf16.msra.mxu1 %v3245_v11  ;;  %v319_v10 = vld [vmem:[%s4748_s1 + $0x938] sm:$0xff]  ;;  %v3307_v11 = vcombine.low %v306_v2, %v310_v3  ;;  %v370_v3 = vld [vmem:[%s4748_s1 + $0xad0] sm:$0xff] }
 0x133   :  { %2702 = vmatprep.subr.bf16.mxu0 %v3252_v13  ;;  %2825 = vmatprep.subr.bf16.mxu1 %v3254_v14  ;;  %v3316_v14 = vcombine.high %v314_v8, %v318_v9 }
 0x136   :  { %2703 = vmatpush1.bf16.msra.mxu0 %v3251_v19  ;;  %2826 = vmatpush1.bf16.msra.mxu1 %v3253_v20  ;;  %v327_v19 = vld [vmem:[%s4748_s1 + $0x978] sm:$0xff]  ;;  %v3315_v20 = vcombine.low %v314_v8, %v318_v9  ;;  %v378_v9 = vld [vmem:[%s4748_s1 + $0xb10] sm:$0xff] }
 0x137   :  { %2704 = vmatprep.subr.bf16.mxu0 %v3260_v23  ;;  %2827 = vmatprep.subr.bf16.mxu1 %v3262_v24  ;;  %v3324_v24 = vcombine.high %v322_v17, %v326_v53  ;;  %v3326_v26 = vcombine.high %v323_v18, %v327_v19 }
 0x13a   :  { %2705 = vmatpush1.bf16.msra.mxu0 %v3259_v29  ;;  %2828 = vmatpush1.bf16.msra.mxu1 %v3261_v30  ;;  %v335_v29 = vld [vmem:[%s4748_s1 + $0x9b8] sm:$0xff]  ;;  %v3323_v30 = vcombine.low %v322_v17, %v326_v53  ;;  %v386_v53 = vld [vmem:[%s4748_s1 + $0xb50] sm:$0xff] }
 0x13b   :  { %2706 = vmatprep.subr.bf16.mxu0 %v3268_v32  ;;  %2829 = vmatprep.subr.bf16.mxu1 %v3270_v33  ;;  %v3325_v32 = vcombine.low %v323_v18, %v327_v19  ;;  %v3332_v33 = vcombine.high %v330_v27, %v334_v15  ;;  %v3334_v34 = vcombine.high %v331_v28, %v335_v29  ;;  %v390_v18 = vld [vmem:[%s4748_s1 + $0xb70] sm:$0xff]  ;;  %v387_v19 = vld [vmem:[%s4748_s1 + $0xb58] sm:$0xff] }
 0x13e   :  { %2707 = vmatpush1.bf16.msra.mxu0 %v3267_v39  ;;  %2830 = vmatpush1.bf16.msra.mxu1 %v3269_v40  ;;  %v343_v39 = vld [vmem:[%s4748_s1 + $0x9f8] sm:$0xff]  ;;  %v3331_v40 = vcombine.low %v330_v27, %v334_v15  ;;  %v394_v15 = vld [vmem:[%s4748_s1 + $0xb90] sm:$0xff] }
 0x13f   :  { %2708 = vmatprep.subr.bf16.mxu0 %v3276_v41  ;;  %2831 = vmatprep.subr.bf16.mxu1 %v3278_v42  ;;  %v3333_v41 = vcombine.low %v331_v28, %v335_v29  ;;  %v3340_v42 = vcombine.high %v338_v35, %v342_v37  ;;  %v3342_v25 = vcombine.high %v339_v38, %v343_v39  ;;  %v398_v28 = vld [vmem:[%s4748_s1 + $0xbb0] sm:$0xff]  ;;  %v395_v29 = vld [vmem:[%s4748_s1 + $0xb98] sm:$0xff] }
 0x142   :  { %2709 = vmatpush1.bf16.msra.mxu0 %v3275_v46  ;;  %2832 = vmatpush1.bf16.msra.mxu1 %v3277_v47  ;;  %v351_v46 = vld [vmem:[%s4748_s1 + $0xa38] sm:$0xff]  ;;  %v3339_v47 = vcombine.low %v338_v35, %v342_v37  ;;  %v402_v37 = vld [vmem:[%s4748_s1 + $0xbd0] sm:$0xff] }
 0x143   :  { %2719 = vmatprep.subr.bf16.mxu0 %v3284_v48  ;;  %2842 = vmatprep.subr.bf16.mxu1 %v3286_v49  ;;  %v3341_v48 = vcombine.low %v339_v38, %v343_v39  ;;  %v3348_v49 = vcombine.high %v346_v43, %v350_v44  ;;  %v3350_v50 = vcombine.high %v347_v45, %v351_v46  ;;  %v406_v38 = vld [vmem:[%s4748_s1 + $0xbf0] sm:$0xff]  ;;  %v403_v39 = vld [vmem:[%s4748_s1 + $0xbd8] sm:$0xff] }
 0x145   :  { %2711 = vmatmul.mubr.bf16.vlgmr.msra.gmra.mrb[4].mxu0 %v3920_v22  ;;  %2834 = vmatmul.mubr.bf16.vlgmr.msra.gmra.mrb[4].mxu1 %v3920_v22  ;;  %v307_v22 = vld [vmem:[%s4748_s1 + $0x8d8] sm:$0xff] }
 0x146   :  { %2720 = vmatpush1.bf16.msra.mxu0 %v3283_v55  ;;  %2843 = vmatpush1.bf16.msra.mxu1 %v3285_v56  ;;  %v3310_v7 = vcombine.high %v307_v22, %v311_v4  ;;  %v3309_v13 = vcombine.low %v307_v22, %v311_v4  ;;  %v359_v55 = vld [vmem:[%s4748_s1 + $0xa78] sm:$0xff]  ;;  %v3347_v56 = vcombine.low %v346_v43, %v350_v44  ;;  %v374_v22 = vld [vmem:[%s4748_s1 + $0xaf0] sm:$0xff] }
 0x147   :  { %2721 = vmatprep.subr.bf16.mxu0 %v3292_v58  ;;  %2844 = vmatprep.subr.bf16.mxu1 %v3294_v59  ;;  %v3349_v58 = vcombine.low %v347_v45, %v351_v46  ;;  %v3356_v59 = vcombine.high %v354_v51, %v358_v52  ;;  %v3358_v60 = vcombine.high %v355_v54, %v359_v55  ;;  %v371_v4 = vld [vmem:[%s4748_s1 + $0xad8] sm:$0xff]  ;;  %v410_v46 = vlaneseq }
 0x148   :  { %2751 = vmatprep.mubr.bf16.mxu0 %v3941_v31  ;;  %2874 = vmatprep.mubr.bf16.mxu1 %v3941_v31  ;;  %v315_v31 = vld [vmem:[%s4748_s1 + $0x918] sm:$0xff]  ;;  %v3403_v44 = vcombine.low %v402_v37, %v406_v38 }
 0x149   :  { %v3318_v16 = vcombine.high %v315_v31, %v319_v10  ;;  %v3317_v23 = vcombine.low %v315_v31, %v319_v10  ;;  %v382_v31 = vld [vmem:[%s4748_s1 + $0xb30] sm:$0xff]  ;;  %v379_v10 = vld [vmem:[%s4748_s1 + $0xb18] sm:$0xff] }
 0x14a   :  { %2722 = vmatpush1.bf16.msra.mxu0 %v3291_v12  ;;  %2845 = vmatpush1.bf16.msra.mxu1 %v3293_v63  ;;  %v367_v12 = vld [vmem:[%s4748_s1 + $0xab8] sm:$0xff]  ;;  %v3355_v63 = vcombine.low %v354_v51, %v358_v52 }
 0x14b   :  { %2723 = vmatprep.subr.bf16.mxu0 %v3300_v0  ;;  %2846 = vmatprep.subr.bf16.mxu1 %v3302_v1  ;;  %v3357_v0 = vcombine.low %v355_v54, %v359_v55  ;;  %v3364_v1 = vcombine.high %v362_v61, %v366_v57  ;;  %v3366_v2 = vcombine.high %v363_v62, %v367_v12 }
 0x14e   :  { %2724 = vmatpush1.bf16.msra.mxu0 %v3299_v5  ;;  %2847 = vmatpush1.bf16.msra.mxu1 %v3301_v21  ;;  %v375_v5 = vld [vmem:[%s4748_s1 + $0xaf8] sm:$0xff]  ;;  %v3363_v21 = vcombine.low %v362_v61, %v366_v57 }
 0x14f   :  { %2725 = vmatprep.subr.bf16.mxu0 %v3308_v6  ;;  %2848 = vmatprep.subr.bf16.mxu1 %v3310_v7  ;;  %v3365_v6 = vcombine.low %v363_v62, %v367_v12  ;;  %v3372_v7 = vcombine.high %v370_v3, %v374_v22  ;;  %v3374_v8 = vcombine.high %v371_v4, %v375_v5 }
 0x152   :  { %2726 = vmatpush1.bf16.msra.mxu0 %v3307_v11  ;;  %2849 = vmatpush1.bf16.msra.mxu1 %v3309_v13  ;;  %v383_v11 = vld [vmem:[%s4748_s1 + $0xb38] sm:$0xff]  ;;  %v3371_v13 = vcombine.low %v370_v3, %v374_v22 }
 0x153   :  { %2727 = vmatprep.subr.bf16.mxu0 %v3316_v14  ;;  %2850 = vmatprep.subr.bf16.mxu1 %v3318_v16  ;;  %v3373_v14 = vcombine.low %v371_v4, %v375_v5  ;;  %v3380_v16 = vcombine.high %v378_v9, %v382_v31  ;;  %v3382_v17 = vcombine.high %v379_v10, %v383_v11 }
 0x156   :  { %2728 = vmatpush1.bf16.msra.mxu0 %v3315_v20  ;;  %2851 = vmatpush1.bf16.msra.mxu1 %v3317_v23  ;;  %v391_v20 = vld [vmem:[%s4748_s1 + $0xb78] sm:$0xff]  ;;  %v3379_v23 = vcombine.low %v378_v9, %v382_v31 }
 0x157   :  { %2729 = vmatprep.subr.bf16.mxu0 %v3324_v24  ;;  %2852 = vmatprep.subr.bf16.mxu1 %v3326_v26  ;;  %v3381_v24 = vcombine.low %v379_v10, %v383_v11  ;;  %v3388_v26 = vcombine.high %v386_v53, %v390_v18  ;;  %v3390_v27 = vcombine.high %v387_v19, %v391_v20 }
 0x15a   :  { %2730 = vmatpush1.bf16.msra.mxu0 %v3323_v30  ;;  %2853 = vmatpush1.bf16.msra.mxu1 %v3325_v32  ;;  %v399_v30 = vld [vmem:[%s4748_s1 + $0xbb8] sm:$0xff]  ;;  %v3387_v32 = vcombine.low %v386_v53, %v390_v18 }
 0x15b   :  { %2731 = vmatprep.subr.bf16.mxu0 %v3332_v33  ;;  %2854 = vmatprep.subr.bf16.mxu1 %v3334_v34  ;;  %v3389_v33 = vcombine.low %v387_v19, %v391_v20  ;;  %v3396_v34 = vcombine.high %v394_v15, %v398_v28  ;;  %v3398_v35 = vcombine.high %v395_v29, %v399_v30 }
 0x15e   :  { %2732 = vmatpush1.bf16.msra.mxu0 %v3331_v40  ;;  %2855 = vmatpush1.bf16.msra.mxu1 %v3333_v41  ;;  %v407_v40 = vld [vmem:[%s4748_s1 + $0xbf8] sm:$0xff]  ;;  %v3395_v41 = vcombine.low %v394_v15, %v398_v28 }
 0x15f   :  { %2733 = vmatprep.subr.bf16.mxu0 %v3340_v42  ;;  %2856 = vmatprep.subr.bf16.mxu1 %v3342_v25  ;;  %v3397_v42 = vcombine.low %v395_v29, %v399_v30  ;;  %v3404_v25 = vcombine.high %v402_v37, %v406_v38  ;;  %v3406_v43 = vcombine.high %v403_v39, %v407_v40 }
 0x160   :  { %v3405_v45 = vcombine.low %v403_v39, %v407_v40 }
 0x162   :  { %2734 = vmatpush1.bf16.msra.mxu0 %v3339_v47  ;;  %2857 = vmatpush1.bf16.msra.mxu1 %v3341_v48  ;;  %v411_v47 = vshrl.u32 %v410_v46, 7 }
 0x163   :  { %2735 = vmatprep.subr.bf16.mxu0 %v3348_v49  ;;  %2858 = vmatprep.subr.bf16.mxu1 %v3350_v50  ;;  %v3407_v49 = vld [vmem:[%s4750_s3 + $0x1] ss:$2 sm:$0xff] }
 0x164   :  { %v412_v48 = vsub.s32 0, %v411_v47  ;;  %v4709_v50 = vld [vmem:[%s4751_s2] sm:$0xff]  ;;  %v420_v51 = vsub.s32 2, %v411_v47  ;;  %v416_v52 = vsub.s32 1, %v411_v47  ;;  %v424_v54 = vsub.s32 3, %v411_v47 }
 0x165   :  { %v4711_v55 = vsub.f32 0.0, %v3407_v49  ;;  %v436_v15 = vsub.s32 6, %v411_v47  ;;  %v432_v28 = vsub.s32 5, %v411_v47  ;;  %v440_v29 = vsub.s32 7, %v411_v47 }
 0x166   :  { %2736 = vmatpush1.bf16.msra.mxu0 %v3347_v56  ;;  %2859 = vmatpush1.bf16.msra.mxu1 %v3349_v58  ;;  %v413_v56 = vrot.slane %v4709_v50, %v412_v48  ;;  %v421_v58 = vrot.slane %v4709_v50, %v420_v51 }
 0x167   :  { %2737 = vmatprep.subr.bf16.mxu0 %v3356_v59  ;;  %2860 = vmatprep.subr.bf16.mxu1 %v3358_v60  ;;  %v417_v59 = vrot.slane %v4709_v50, %v416_v52  ;;  %v425_v60 = vrot.slane %v4709_v50, %v424_v54  ;;  %v2940_v62 = vrot.slane %v4711_v55, %v412_v48 }
 0x168   :  { %v2944_v22 = vrot.slane %v4711_v55, %v416_v52  ;;  %v2952_v9 = vrot.slane %v4711_v55, %v424_v54 }
 0x16a   :  { %2738 = vmatpush1.bf16.msra.mxu0 %v3355_v63  ;;  %2861 = vmatpush1.bf16.msra.mxu1 %v3357_v0 }
 0x16b   :  { %2739 = vmatprep.subr.bf16.mxu0 %v3364_v1  ;;  %2862 = vmatprep.subr.bf16.mxu1 %v3366_v2  ;;  %v2948_v1 = vrot.slane %v4711_v55, %v420_v51 }
 0x16e   :  { %2740 = vmatpush1.bf16.msra.mxu0 %v3363_v21  ;;  %2863 = vmatpush1.bf16.msra.mxu1 %v3365_v6 }
 0x16f   :  { %2741 = vmatprep.subr.bf16.mxu0 %v3372_v7  ;;  %2864 = vmatprep.subr.bf16.mxu1 %v3374_v8 }
 0x172   :  { %2742 = vmatpush1.bf16.msra.mxu0 %v3371_v13  ;;  %2865 = vmatpush1.bf16.msra.mxu1 %v3373_v14 }
 0x173   :  { %2743 = vmatprep.subr.bf16.mxu0 %v3380_v16  ;;  %2866 = vmatprep.subr.bf16.mxu1 %v3382_v17 }
 0x176   :  { %2744 = vmatpush1.bf16.msra.mxu0 %v3379_v23  ;;  %2867 = vmatpush1.bf16.msra.mxu1 %v3381_v24 }
 0x177   :  { %2745 = vmatprep.subr.bf16.mxu0 %v3388_v26  ;;  %2868 = vmatprep.subr.bf16.mxu1 %v3390_v27  ;;  %v428_v27 = vsub.s32 4, %v411_v47 }
 0x179   :  { %v429_v30 = vrot.slane %v4709_v50, %v428_v27  ;;  %v2956_v38 = vrot.slane %v4711_v55, %v428_v27 }
 0x17a   :  { %2746 = vmatpush1.bf16.msra.mxu0 %v3387_v32  ;;  %2869 = vmatpush1.bf16.msra.mxu1 %v3389_v33  ;;  %v437_v32 = vrot.slane %v4709_v50, %v436_v15  ;;  %v433_v33 = vrot.slane %v4709_v50, %v432_v28 }
 0x17b   :  { %2747 = vmatprep.subr.bf16.mxu0 %v3396_v34  ;;  %2870 = vmatprep.subr.bf16.mxu1 %v3398_v35  ;;  %v441_v34 = vrot.slane %v4709_v50, %v440_v29 }
 0x17e   :  { %2748 = vmatpush1.bf16.msra.mxu0 %v3395_v41  ;;  %2871 = vmatpush1.bf16.msra.mxu1 %v3397_v42 }
 0x17f   :  { %2749 = vmatprep.subr.bf16.mxu0 %v3404_v25  ;;  %2872 = vmatprep.subr.bf16.mxu1 %v3406_v43  ;;  %v2960_v25 = vrot.slane %v4711_v55, %v432_v28 }
 0x182   :  { %2750 = vmatpush1.bf16.msra.mxu0 %v3403_v44  ;;  %2873 = vmatpush1.bf16.msra.mxu1 %v3405_v45  ;;  %v2964_v45 = vrot.slane %v4711_v55, %v436_v15 }
 0x185   :  { %2752 = vmatmul.mubr.bf16.vlgmr.msra.gmra.mrb[4].mxu0 %v4129_v36  ;;  %2875 = vmatmul.mubr.bf16.vlgmr.msra.gmra.mrb[4].mxu1 %v4129_v36  ;;  %v4717_v36 = vld [vmem:[%s4750_s3] ss:$2 sm:$0xff] }
 0x186   :  { %v2899_v57 = vrot.slane %v4717_v36, %v412_v48  ;;  %v2907_v12 = vrot.slane %v4717_v36, %v420_v51  ;;  %v2903_v3 = vrot.slane %v4717_v36, %v416_v52  ;;  %v2911_v8 = vrot.slane %v4717_v36, %v424_v54 }
 0x187   :  { %v2915_v37 = vrot.slane %v4717_v36, %v428_v27  ;;  %v2919_v42 = vrot.slane %v4717_v36, %v432_v28  ;;  %v2923_v44 = vrot.slane %v4717_v36, %v436_v15  ;;  %v2927_v52 = vrot.slane %v4717_v36, %v440_v29 }
 0x188   :  { %v3003_v36 = vstv %s4752_s4 }
 0x198   :  { %v2507_v61 = vpop.f32.mrb[0].mxu0  ;;  %v2630_v0 = vpop.f32.mrb[0].mxu1 }
 0x199   :  { %v3408_v63 = vadd.f32 %v2507_v61, %v413_v56  ;;  %v2509_v2 = vpop.f32.mrb[1].mxu0  ;;  %v3410_v4 = vadd.f32 %v2630_v0, %v421_v58  ;;  %v2632_v21 = vpop.f32.mrb[1].mxu1  ;;  %v2968_v58 = vrot.slane %v4711_v55, %v440_v29 }
 0x19a   :  { %v3409_v5 = vadd.f32 %v2509_v2, %v417_v59  ;;  %v2511_v6 = vpop.f32.mrb[2].mxu0  ;;  %v3411_v7 = vadd.f32 %v2632_v21, %v425_v60  ;;  %v2634_v31 = vpop.f32.mrb[2].mxu1 }
 0x19b   :  { %vm2886_vm0 = vcmp.gt.f32.partialorder %v3408_v63, 0.0  ;;  %v2512_v10 = vpop.f32.mrb[3].mxu0  ;;  %vm2888_vm1 = vcmp.gt.f32.partialorder %v3410_v4, 0.0  ;;  %v2635_v13 = vpop.f32.mrb[3].mxu1 }
 0x19c   :  { %v2977_v11 = vsel %vm2886_vm0, %v2899_v57, %v2940_v62  ;;  %vm2887_vm2 = vcmp.gt.f32.partialorder %v3409_v5, 0.0  ;;  %v2979_v16 = vsel %vm2888_vm1, %v2907_v12, %v2948_v1  ;;  %vm2889_vm3 = vcmp.gt.f32.partialorder %v3411_v7, 0.0 }
 0x19d   :  { %v2985_v14 = vmul.f32 %v3408_v63, %v2977_v11  ;;  %v2978_v17 = vsel %vm2887_vm2, %v2903_v3, %v2944_v22  ;;  %v2980_v18 = vsel %vm2889_vm3, %v2911_v8, %v2952_v9  ;;  %v2987_v19 = vmul.f32 %v3410_v4, %v2979_v16 }
 0x19e   :  { %v2986_v53 = vmul.f32 %v3409_v5, %v2978_v17  ;;  %v2988_v23 = vmul.f32 %v3411_v7, %v2980_v18 }
 0x1a0   :  { %v2993_v20 = vadd.f32 %v2986_v53, %v2985_v14 }
 0x1a2   :  { %v2994_v24 = vadd.f32 %v2993_v20, %v2987_v19 }
 0x1a4   :  { %v2995_v26 = vadd.f32 %v2994_v24, %v2988_v23 }
 0x258   :  { %v2753_v35 = vpop.f32.mrb[4].mxu0  ;;  %v2876_v40 = vpop.f32.mrb[4].mxu1 }
 0x259   :  { %v3412_v39 = vadd.f32 %v2753_v35, %v429_v30  ;;  %v2755_v41 = vpop.f32.mrb[5].mxu0  ;;  %v3414_v43 = vadd.f32 %v2876_v40, %v437_v32  ;;  %v2878_v47 = vpop.f32.mrb[5].mxu1 }
 0x25a   :  { %v3413_v46 = vadd.f32 %v2755_v41, %v433_v33  ;;  %v2757_v48 = vpop.f32.mrb[6].mxu0  ;;  %v3415_v49 = vadd.f32 %v2878_v47, %v441_v34  ;;  %v2880_v50 = vpop.f32.mrb[6].mxu1 }
 0x25b   :  { %vm2890_vm4 = vcmp.gt.f32.partialorder %v3412_v39, 0.0  ;;  %v2758_v51 = vpop.f32.mrb[7].mxu0  ;;  %vm2892_vm5 = vcmp.gt.f32.partialorder %v3414_v43, 0.0  ;;  %v2881_v56 = vpop.f32.mrb[7].mxu1 }
 0x25c   :  { %v2981_v54 = vsel %vm2890_vm4, %v2915_v37, %v2956_v38  ;;  %vm2891_vm6 = vcmp.gt.f32.partialorder %v3413_v46, 0.0  ;;  %vm2893_vm7 = vcmp.gt.f32.partialorder %v3415_v49, 0.0  ;;  %v2983_v61 = vsel %vm2892_vm5, %v2923_v44, %v2964_v45 }
 0x25d   :  { %v2989_v59 = vmul.f32 %v3412_v39, %v2981_v54  ;;  %v2982_v60 = vsel %vm2891_vm6, %v2919_v42, %v2960_v25  ;;  %v2984_v12 = vsel %vm2893_vm7, %v2927_v52, %v2968_v58  ;;  %v2991_v63 = vmul.f32 %v3414_v43, %v2983_v61 }
 0x25e   :  { %v2990_v57 = vmul.f32 %v3413_v46, %v2982_v60  ;;  %v2992_v1 = vmul.f32 %v3415_v49, %v2984_v12 }
 0x25f   :  { %v2996_v62 = vadd.f32 %v2995_v26, %v2989_v59 }
 0x261   :  { %v2997_v0 = vadd.f32 %v2996_v62, %v2990_v57 }
 0x263   :  { %v2998_v2 = vadd.f32 %v2997_v0, %v2991_v63 }
 0x265   :  { %v2999_v3 = vadd.f32 %v2998_v2, %v2992_v1 }
 0x267   :  { %3000 = vadd.xlane.f32.xlu0 %v2999_v3 }
 0x2f4   :  { %v3001_v22 = vpop.xlane.xlu0 %3000 }
 0x2f5   :  { %v3004_v4 = vadd.f32 %v3003_v36, %v3001_v22 }
 0x2f7   :  { %v3005_v55 = vsub.f32 0.0, %v3004_v4 }
 0x2f9   :  { %v3006_v5 = vmul.f32 1.442695, %v3005_v55 }
 0x2fb   :  { %3454 = vpow2.f32 %v3006_v5 }
 0x305   :  { %v3455_v21 = vpop.eup %3454 }
 0x306   :  { %v3008_v6 = vadd.f32 1.0, %v3455_v21 }
 0x308   :  { %3456 = vrcp.f32 %v3008_v6 }
 0x312   :  { %v3457_v7 = vpop.eup %3456 }
 0x313   :  { %3012 = vst.msk [vmem:[%s4753_s5] sm:$0xff] %vm3011_vm8, %v3457_v7 }

</bundles_post_ra>
